<compile_context>
chip_gen: v7x
topology: tpu7x:2x2x1
jax: 0.10.0
libtpu: 0.0.40
codegen_flags: <defaults>
</compile_context>

<pallas_src>
import functools

import jax
import jax.numpy as jnp
from jax import lax
from jax.experimental import pallas as pl
from jax.experimental.pallas import tpu as pltpu


def _mha_kernel(q_ref, k_ref, v_ref,
                wq_ref, bq_ref, wk_ref, bk_ref, wv_ref, bv_ref,
                wm_ref, bm_ref,
                out_ref,
                k_heads_ref, v_heads_ref,
                *, num_heads, dim, n_valid, tkv, mxu_dtype):
    """Grid step (b, qi): one query tile of one batch element, all heads."""
    d_model = num_heads * dim
    n_pad = k_heads_ref.shape[-1]          # padded sequence length
    tq = q_ref.shape[-1]                   # query-tile width
    nkv = n_pad // tkv                     # number of key/value tiles (static)
    qi = pl.program_id(1)

    # ---- once per batch element: project K/V for the whole padded sequence ----
    # (chunked over tkv columns so the f32 transient is (d_model, tkv), not
    #  (d_model, n_pad); results stored per-head in mxu_dtype scratch).
    @pl.when(qi == 0)
    def _project_kv():
        @pl.loop(0, nkv)
        def _(t):
            sl = pl.ds(pl.multiple_of(t * tkv, tkv), tkv)
            kf = jnp.dot(wk_ref[...], k_ref[:, sl],
                         preferred_element_type=jnp.float32) + bk_ref[...]
            vf = jnp.dot(wv_ref[...], v_ref[:, sl],
                         preferred_element_type=jnp.float32) + bv_ref[...]
            k_heads_ref[:, :, sl] = kf.reshape(num_heads, dim, tkv).astype(mxu_dtype)
            v_heads_ref[:, :, sl] = vf.reshape(num_heads, dim, tkv).astype(mxu_dtype)

    # ---- Q projection for this query tile (1/sqrt(dim) folded into Wq/bq) ----
    qf = jnp.dot(wq_ref[...], q_ref[...],
                 preferred_element_type=jnp.float32) + bq_ref[...]     # (d_model, tq)
    q_heads = qf.reshape(num_heads, dim, tq).astype(mxu_dtype)         # (H, dim, tq)

    # ---- online-softmax (flash) loop over key/value tiles --------------------
    def _kv_step(t, carry):
        m, l, acc = carry
        start = t * tkv
        if not isinstance(start, int):
            start = pl.multiple_of(start, tkv)
        sl = pl.ds(start, tkv)
        k_t = k_heads_ref[:, :, sl]                                    # (H, dim, tkv)
        v_t = v_heads_ref[:, :, sl]
        # s[h, k, q] = sum_d k[h, d, k] * q[h, d, q]      (no transposes)
        s = lax.dot_general(k_t, q_heads, (((1,), (1,)), ((0,), (0,))),
                            preferred_element_type=jnp.float32)        # (H, tkv, tq)
        if n_valid < n_pad:
            # kill padded key rows for all heads at once (additive-mask style)
            row = lax.broadcasted_iota(jnp.int32, (1, tkv, 1), 1) + t * tkv
            s = jnp.where(row < n_valid, s, -1e9)
        m_new = jnp.maximum(m, jnp.max(s, axis=1, keepdims=True))      # (H, 1, tq)
        alpha = jnp.exp(m - m_new)
        p = jnp.exp(s - m_new)                                         # f32 softmax
        l_new = alpha * l + jnp.sum(p, axis=1, keepdims=True)
        # pv[h, d, q] = sum_k v[h, d, k] * p[h, k, q]
        pv = lax.dot_general(v_t, p.astype(mxu_dtype),
                             (((2,), (1,)), ((0,), (0,))),
                             preferred_element_type=jnp.float32)       # (H, dim, tq)
        return m_new, l_new, alpha * acc + pv

    m0 = jnp.full((num_heads, 1, tq), -jnp.inf, jnp.float32)
    l0 = jnp.zeros((num_heads, 1, tq), jnp.float32)
    a0 = jnp.zeros((num_heads, dim, tq), jnp.float32)
    if nkv <= 4:                           # short static loop: keep it visible
        m, l, acc = m0, l0, a0
        for t in range(nkv):
            m, l, acc = _kv_step(t, (m, l, acc))
    else:
        m, l, acc = lax.fori_loop(0, nkv, _kv_step, (m0, l0, a0))

    # ---- normalize, merge projection, store ----------------------------------
    x_heads = acc * pl.reciprocal(l, approx=True)                      # (H, dim, tq)
    x_all = x_heads.reshape(d_model, tq).astype(mxu_dtype)             # (d_model, tq)
    out = jnp.dot(wm_ref[...], x_all,
                  preferred_element_type=jnp.float32) + bm_ref[...]
    out_ref[...] = out.astype(out_ref.dtype)


def _pick_tile(n, candidates):
    for c in candidates:
        if c <= n and n % c == 0:
            return c
    return n


def _vmem_cap_bytes():
    # v7x: 64 MiB VMEM per TensorCore -> leave pipeline headroom (~48 MiB).
    # v5e / v6e: 128 MiB -> allow up to ~100 MiB.
    try:
        kind = jax.devices()[0].device_kind.lower()
    except Exception:
        kind = ""
    return (48 << 20) if "v7" in kind else (100 << 20)


def multi_headed_attention(query, key, value, params, num_heads, *,
                           mxu_dtype=jnp.bfloat16):
    """Pallas implementation of MultiHeadedAttention.forward (mask=None)."""
    B, d_model, N = query.shape
    assert d_model % num_heads == 0
    dim = d_model // num_heads
    scale = 1.0 / (dim ** 0.5)
    f32 = jnp.float32

    # PyTorch's view(B, dim, heads, N) maps output channel c -> (d, h) with
    # c = d*heads + h. Permute channels so head h occupies contiguous rows
    # [h*dim, (h+1)*dim): perm[h*dim + d] = d*heads + h.
    perm = (jnp.arange(dim)[None, :] * num_heads
            + jnp.arange(num_heads)[:, None]).reshape(-1)

    wq = (params["wq"].astype(f32) * scale)[perm].astype(mxu_dtype)  # fold 1/sqrt(dim)
    bq = (params["bq"].astype(f32) * scale)[perm][:, None]           # biases stay f32
    wk = params["wk"].astype(f32)[perm].astype(mxu_dtype)
    bk = params["bk"].astype(f32)[perm][:, None]
    wv = params["wv"].astype(f32)[perm].astype(mxu_dtype)
    bv = params["bv"].astype(f32)[perm][:, None]
    wm = params["wm"].astype(f32)[:, perm].astype(mxu_dtype)         # consumes permuted rows
    bm = params["bm"].astype(f32)[:, None]

    # Lane-dense sequence axis: pad N up to a multiple of 128; padded key rows
    # are neutralized in-kernel with an additive -1e9 score bias.
    n_pad = ((N + 127) // 128) * 128
    q_in = query.astype(mxu_dtype)
    k_in = key.astype(mxu_dtype)
    v_in = value.astype(mxu_dtype)
    if n_pad != N:
        pad = ((0, 0), (0, 0), (0, n_pad - N))
        q_in, k_in, v_in = (jnp.pad(a, pad) for a in (q_in, k_in, v_in))

    tq = _pick_tile(n_pad, (256, 128))        # query tile (grid axis)
    tkv = _pick_tile(n_pad, (512, 256, 128))  # key/value tile (flash loop)
    nq = n_pad // tq
    assert n_pad % tq == 0 and n_pad % tkv == 0

    # VMEM budget derived from the actual footprint (double-buffered blocks +
    # scratch + in-kernel intermediates), capped per generation.
    mxu_bytes = jnp.dtype(mxu_dtype).itemsize
    est = (2 * d_model * tq * mxu_bytes              # query block (x2 buffers)
           + 2 * 2 * d_model * n_pad * mxu_bytes     # key + value slabs (x2 buffers)
           + 2 * d_model * tq * 4                    # output block (x2 buffers)
           + 2 * 4 * d_model * d_model * mxu_bytes   # 4 weight matrices (x2 buffers)
           + 2 * 4 * d_model * 4                     # 4 bias vectors
           + 2 * d_model * n_pad * mxu_bytes         # K/V per-head scratch
           + 3 * num_heads * tkv * tq * 4            # scores / exp intermediates
           + 3 * num_heads * dim * tq * 4            # accumulator / pv / normalized
           + 2 * d_model * max(tq, tkv) * 4)         # projection transients
    vmem_limit = int(min(_vmem_cap_bytes(), max(32 << 20, int(est * 1.5))))

    q_spec = pl.BlockSpec((None, d_model, tq), lambda b, qi: (b, 0, qi))
    kv_spec = pl.BlockSpec((None, d_model, n_pad), lambda b, qi: (b, 0, 0))
    w_spec = pl.BlockSpec((d_model, d_model), lambda b, qi: (0, 0))
    b_spec = pl.BlockSpec((d_model, 1), lambda b, qi: (0, 0))

    out = pl.pallas_call(
        functools.partial(_mha_kernel, num_heads=num_heads, dim=dim,
                          n_valid=N, tkv=tkv, mxu_dtype=mxu_dtype),
        out_shape=jax.ShapeDtypeStruct((B, d_model, n_pad), jnp.float32),
        grid=(B, nq),
        in_specs=[q_spec, kv_spec, kv_spec,
                  w_spec, b_spec,          # Wq (permuted, scaled, mxu dtype), bq
                  w_spec, b_spec,          # Wk, bk
                  w_spec, b_spec,          # Wv, bv
                  w_spec, b_spec],         # Wmerge (columns permuted), bm
        out_specs=q_spec,
        scratch_shapes=[pltpu.VMEM((num_heads, dim, n_pad), mxu_dtype),   # K heads
                        pltpu.VMEM((num_heads, dim, n_pad), mxu_dtype)],  # V heads
        compiler_params=pltpu.CompilerParams(
            dimension_semantics=("parallel", "arbitrary"),
            vmem_limit_bytes=vmem_limit),
    )(q_in, k_in, v_in, wq, bq, wk, bk, wv, bv, wm, bm)

    return out[:, :, :N] if n_pad != N else out


def _reference(query, key, value, params, num_heads):
    """Pure-JAX transcription of the PyTorch forward (mask=None)."""
    B, d_model, N = query.shape
    dim = d_model // num_heads

    def conv1(w, b, x):
        return jnp.einsum("oc,bcn->bon", w, x) + b[None, :, None]

    q = conv1(params["wq"], params["bq"], query).reshape(B, dim, num_heads, N)
    k = conv1(params["wk"], params["bk"], key).reshape(B, dim, num_heads, N)
    v = conv1(params["wv"], params["bv"], value).reshape(B, dim, num_heads, N)
    scores = jnp.einsum("bdhn,bdhm->bhnm", q, k) / (dim ** 0.5)
    prob = jax.nn.softmax(scores, axis=-1)
    x = jnp.einsum("bhnm,bdhm->bdhn", prob, v).reshape(B, d_model, N)
    return conv1(params["wm"], params["bm"], x)


def _make_case(seed, B, num_heads, d_model, N):
    ks = jax.random.split(jax.random.PRNGKey(seed), 11)
    mk = lambda k, shape, s=0.1: (s * jax.random.normal(k, shape)).astype(jnp.float32)
    params = {
        "wq": mk(ks[0], (d_model, d_model)), "bq": mk(ks[1], (d_model,)),
        "wk": mk(ks[2], (d_model, d_model)), "bk": mk(ks[3], (d_model,)),
        "wv": mk(ks[4], (d_model, d_model)), "bv": mk(ks[5], (d_model,)),
        "wm": mk(ks[6], (d_model, d_model)), "bm": mk(ks[7], (d_model,)),
    }
    q = mk(ks[8], (B, d_model, N), 1.0)
    k = mk(ks[9], (B, d_model, N), 1.0)
    v = mk(ks[10], (B, d_model, N), 1.0)
    return params, q, k, v


if __name__ == "__main__":
    # Case 1: tiny shapes (single query tile, single KV tile, tail masking).
    params, q, k, v = _make_case(0, B=2, num_heads=4, d_model=32, N=16)
    ref = _reference(q, k, v, params, 4)

    out_f32 = jax.block_until_ready(
        multi_headed_attention(q, k, v, params, 4, mxu_dtype=jnp.float32))
    if not jnp.allclose(out_f32, ref, atol=5e-3, rtol=5e-3):
        raise AssertionError("f32 Pallas kernel disagrees with JAX reference (case 1)")

    out_bf16 = jax.block_until_ready(
        multi_headed_attention(q, k, v, params, 4))          # default bf16 MXU path
    if not jnp.allclose(out_bf16, ref, atol=5e-2, rtol=5e-2):
        raise AssertionError("bf16 Pallas kernel disagrees with JAX reference (case 1)")

    # Case 2: multiple query tiles + flash KV loop (fori path) + tail masking.
    params2, q2, k2, v2 = _make_case(1, B=2, num_heads=8, d_model=64, N=600)
    ref2 = _reference(q2, k2, v2, params2, 8)
    out2 = jax.block_until_ready(
        multi_headed_attention(q2, k2, v2, params2, 8, mxu_dtype=jnp.float32))
    if not jnp.allclose(out2, ref2, atol=5e-3, rtol=5e-3):
        raise AssertionError("f32 Pallas kernel disagrees with JAX reference (case 2)")

    print("KERNEL_OK")
</pallas_src>

<mosaic_0001>
module attributes {stable_mosaic.version = 11 : i64} {
  func.func @_mha_kernel(%arg0: i32, %arg1: i32, %arg2: memref<1x32x128xf32, #tpu.memory_space<vmem>>, %arg3: memref<1x32x128xf32, #tpu.memory_space<vmem>>, %arg4: memref<1x32x128xf32, #tpu.memory_space<vmem>>, %arg5: memref<32x32xf32, #tpu.memory_space<vmem>>, %arg6: memref<32x1xf32, #tpu.memory_space<vmem>>, %arg7: memref<32x32xf32, #tpu.memory_space<vmem>>, %arg8: memref<32x1xf32, #tpu.memory_space<vmem>>, %arg9: memref<32x32xf32, #tpu.memory_space<vmem>>, %arg10: memref<32x1xf32, #tpu.memory_space<vmem>>, %arg11: memref<32x32xf32, #tpu.memory_space<vmem>>, %arg12: memref<32x1xf32, #tpu.memory_space<vmem>>, %arg13: memref<1x32x128xf32, #tpu.memory_space<vmem>>, %arg14: memref<4x8x128xf32, #tpu.memory_space<vmem>>, %arg15: memref<4x8x128xf32, #tpu.memory_space<vmem>>) attributes {dimension_semantics = [#tpu.dimension_semantics<parallel>, #tpu.dimension_semantics<arbitrary>], iteration_bounds = array<i64: 2, 1>, scalar_prefetch = 0 : i64, scratch_operands = 2 : i64, tpu.core_type = #tpu.core_type<tc>, window_params = [{transform_indices = @transform_0, window_bounds = array<i64: 1, 32, 128>}, {transform_indices = @transform_1, window_bounds = array<i64: 1, 32, 128>}, {transform_indices = @transform_2, window_bounds = array<i64: 1, 32, 128>}, {pipeline_mode = #tpu.pipeline_mode<synchronous>, transform_indices = @transform_3, window_bounds = array<i64: 32, 32>}, {pipeline_mode = #tpu.pipeline_mode<synchronous>, transform_indices = @transform_4, window_bounds = array<i64: 32, 1>}, {pipeline_mode = #tpu.pipeline_mode<synchronous>, transform_indices = @transform_5, window_bounds = array<i64: 32, 32>}, {pipeline_mode = #tpu.pipeline_mode<synchronous>, transform_indices = @transform_6, window_bounds = array<i64: 32, 1>}, {pipeline_mode = #tpu.pipeline_mode<synchronous>, transform_indices = @transform_7, window_bounds = array<i64: 32, 32>}, {pipeline_mode = #tpu.pipeline_mode<synchronous>, transform_indices = @transform_8, window_bounds = array<i64: 32, 1>}, {pipeline_mode = #tpu.pipeline_mode<synchronous>, transform_indices = @transform_9, window_bounds = array<i64: 32, 32>}, {pipeline_mode = #tpu.pipeline_mode<synchronous>, transform_indices = @transform_10, window_bounds = array<i64: 32, 1>}, {transform_indices = @transform_11, window_bounds = array<i64: 1, 32, 128>}]} {
    %c0_i32 = arith.constant 0 : i32
    %0 = arith.cmpi eq, %arg1, %c0_i32 : i32
    %1 = arith.extui %0 : i1 to i32
    %c0_i32_0 = arith.constant 0 : i32
    %2 = arith.cmpi ne, %1, %c0_i32_0 : i32
    scf.if %2 {
      %c0_i32_30 = arith.constant 0 : i32
      %c1_i32 = arith.constant 1 : i32
      %54 = arith.muli %c0_i32_30, %c1_i32 : i32
      %c0_i32_31 = arith.constant 0 : i32
      %55 = arith.addi %c0_i32_31, %54 : i32
      %c128_i32 = arith.constant 128 : i32
      %56 = arith.muli %55, %c128_i32 : i32
      %57 = tpu.assume_multiple %56, 128 : i32
      %c0_32 = arith.constant 0 : index
      %c0_33 = arith.constant 0 : index
      %58 = vector.load %arg7[%c0_32, %c0_33] : memref<32x32xf32, #tpu.memory_space<vmem>>, vector<32x32xf32>
      %c0_34 = arith.constant 0 : index
      %c0_35 = arith.constant 0 : index
      %59 = arith.index_cast %57 : i32 to index
      %60 = vector.load %arg3[%c0_34, %c0_35, %59] : memref<1x32x128xf32, #tpu.memory_space<vmem>>, vector<1x32x128xf32>
      %61 = vector.shape_cast %60 : vector<1x32x128xf32> to vector<32x128xf32>
      %cst_36 = arith.constant dense<0.000000e+00> : vector<32x128xf32>
      %62 = tpu.matmul %58, %61, %cst_36 {dimension_numbers = #tpu.dot_dimension_numbers<[1], [0], [0], [1], [0, 0, 1, 1], [], []>} : vector<32x32xf32>, vector<32x128xf32>, vector<32x128xf32> -> vector<32x128xf32>
      %c0_37 = arith.constant 0 : index
      %c0_38 = arith.constant 0 : index
      %63 = vector.load %arg8[%c0_37, %c0_38] : memref<32x1xf32, #tpu.memory_space<vmem>>, vector<32x1xf32>
      %64 = vector.broadcast %63 : vector<32x1xf32> to vector<32x128xf32>
      %65 = arith.addf %62, %64 : vector<32x128xf32>
      %c0_39 = arith.constant 0 : index
      %c0_40 = arith.constant 0 : index
      %66 = vector.load %arg9[%c0_39, %c0_40] : memref<32x32xf32, #tpu.memory_space<vmem>>, vector<32x32xf32>
      %c0_41 = arith.constant 0 : index
      %c0_42 = arith.constant 0 : index
      %67 = arith.index_cast %57 : i32 to index
      %68 = vector.load %arg4[%c0_41, %c0_42, %67] : memref<1x32x128xf32, #tpu.memory_space<vmem>>, vector<1x32x128xf32>
      %69 = vector.shape_cast %68 : vector<1x32x128xf32> to vector<32x128xf32>
      %cst_43 = arith.constant dense<0.000000e+00> : vector<32x128xf32>
      %70 = tpu.matmul %66, %69, %cst_43 {dimension_numbers = #tpu.dot_dimension_numbers<[1], [0], [0], [1], [0, 0, 1, 1], [], []>} : vector<32x32xf32>, vector<32x128xf32>, vector<32x128xf32> -> vector<32x128xf32>
      %c0_44 = arith.constant 0 : index
      %c0_45 = arith.constant 0 : index
      %71 = vector.load %arg10[%c0_44, %c0_45] : memref<32x1xf32, #tpu.memory_space<vmem>>, vector<32x1xf32>
      %72 = vector.broadcast %71 : vector<32x1xf32> to vector<32x128xf32>
      %73 = arith.addf %70, %72 : vector<32x128xf32>
      %74 = vector.shape_cast %65 : vector<32x128xf32> to vector<4x8x128xf32>
      %c0_46 = arith.constant 0 : index
      %c0_47 = arith.constant 0 : index
      %75 = arith.index_cast %57 : i32 to index
      %76 = vector.load %arg14[%c0_46, %c0_47, %75] : memref<4x8x128xf32, #tpu.memory_space<vmem>>, vector<4x8x128xf32>
      tpu.vector_store %arg14[%c0_46, %c0_47, %75], %74 {strides = array<i32>} : memref<4x8x128xf32, #tpu.memory_space<vmem>>, vector<4x8x128xf32>,
      %77 = vector.shape_cast %73 : vector<32x128xf32> to vector<4x8x128xf32>
      %c0_48 = arith.constant 0 : index
      %c0_49 = arith.constant 0 : index
      %78 = arith.index_cast %57 : i32 to index
      %79 = vector.load %arg15[%c0_48, %c0_49, %78] : memref<4x8x128xf32, #tpu.memory_space<vmem>>, vector<4x8x128xf32>
      tpu.vector_store %arg15[%c0_48, %c0_49, %78], %77 {strides = array<i32>} : memref<4x8x128xf32, #tpu.memory_space<vmem>>, vector<4x8x128xf32>,
      %c1_i32_50 = arith.constant 1 : i32
    } else {
    }
    %c0 = arith.constant 0 : index
    %c0_1 = arith.constant 0 : index
    %3 = vector.load %arg5[%c0, %c0_1] : memref<32x32xf32, #tpu.memory_space<vmem>>, vector<32x32xf32>
    %c0_2 = arith.constant 0 : index
    %c0_3 = arith.constant 0 : index
    %c0_4 = arith.constant 0 : index
    %4 = vector.load %arg2[%c0_2, %c0_3, %c0_4] : memref<1x32x128xf32, #tpu.memory_space<vmem>>, vector<1x32x128xf32>
    %5 = vector.shape_cast %4 : vector<1x32x128xf32> to vector<32x128xf32>
    %cst = arith.constant dense<0.000000e+00> : vector<32x128xf32>
    %6 = tpu.matmul %3, %5, %cst {dimension_numbers = #tpu.dot_dimension_numbers<[1], [0], [0], [1], [0, 0, 1, 1], [], []>} : vector<32x32xf32>, vector<32x128xf32>, vector<32x128xf32> -> vector<32x128xf32>
    %c0_5 = arith.constant 0 : index
    %c0_6 = arith.constant 0 : index
    %7 = vector.load %arg6[%c0_5, %c0_6] : memref<32x1xf32, #tpu.memory_space<vmem>>, vector<32x1xf32>
    %8 = vector.broadcast %7 : vector<32x1xf32> to vector<32x128xf32>
    %9 = arith.addf %6, %8 : vector<32x128xf32>
    %10 = vector.shape_cast %9 : vector<32x128xf32> to vector<4x8x128xf32>
    %cst_7 = arith.constant 0xFF800000 : f32
    %11 = vector.broadcast %cst_7 : f32 to vector<4x1x128xf32>
    %cst_8 = arith.constant 0.000000e+00 : f32
    %12 = vector.broadcast %cst_8 : f32 to vector<4x1x128xf32>
    %cst_9 = arith.constant 0.000000e+00 : f32
    %13 = vector.broadcast %cst_9 : f32 to vector<4x8x128xf32>
    %c0_10 = arith.constant 0 : index
    %c0_11 = arith.constant 0 : index
    %c0_12 = arith.constant 0 : index
    %14 = vector.load %arg14[%c0_10, %c0_11, %c0_12] : memref<4x8x128xf32, #tpu.memory_space<vmem>>, vector<4x8x128xf32>
    %c0_13 = arith.constant 0 : index
    %c0_14 = arith.constant 0 : index
    %c0_15 = arith.constant 0 : index
    %15 = vector.load %arg15[%c0_13, %c0_14, %c0_15] : memref<4x8x128xf32, #tpu.memory_space<vmem>>, vector<4x8x128xf32>
    %cst_16 = arith.constant dense<0.000000e+00> : vector<4x128x128xf32>
    %16 = tpu.matmul %14, %10, %cst_16 {dimension_numbers = #tpu.dot_dimension_numbers<[1], [1], [2], [2], [0, 0, 0, 2, 1, 2], [0], [0]>} : vector<4x8x128xf32>, vector<4x8x128xf32>, vector<4x128x128xf32> -> vector<4x128x128xf32>
    %17 = tpu.iota {dimensions = array<i32: 1>} : vector<1x128x1xi32>
    %c0_i32_17 = arith.constant 0 : i32
    %18 = vector.broadcast %c0_i32_17 : i32 to vector<1x128x1xi32>
    %19 = arith.addi %17, %18 : vector<1x128x1xi32>
    %c16_i32 = arith.constant 16 : i32
    %20 = vector.broadcast %c16_i32 : i32 to vector<1x128x1xi32>
    %21 = arith.cmpi slt, %19, %20 : vector<1x128x1xi32>
    %cst_18 = arith.constant -1.000000e+09 : f32
    %22 = vector.shape_cast %21 : vector<1x128x1xi1> to vector<1x128x1xi1>
    %23 = vector.broadcast %22 : vector<1x128x1xi1> to vector<4x128x128xi1>
    %24 = vector.broadcast %cst_18 : f32 to vector<4x128x128xf32>
    %25 = arith.select %23, %16, %24 : vector<4x128x128xi1>, vector<4x128x128xf32>
    %cst_19 = arith.constant dense<0xFF800000> : vector<4x128xf32>
    %26 = vector.multi_reduction <maximumf>, %25, %cst_19 [1] : vector<4x128x128xf32> to vector<4x128xf32>
    %27 = vector.shape_cast %26 : vector<4x128xf32> to vector<4x1x128xf32>
    %28 = arith.maximumf %11, %27 : vector<4x1x128xf32>
    %29 = arith.subf %11, %28 : vector<4x1x128xf32>
    %30 = math.exp %29 : vector<4x1x128xf32>
    %31 = vector.broadcast %28 : vector<4x1x128xf32> to vector<4x128x128xf32>
    %32 = arith.subf %25, %31 : vector<4x128x128xf32>
    %33 = math.exp %32 : vector<4x128x128xf32>
    %34 = arith.mulf %30, %12 : vector<4x1x128xf32>
    %cst_20 = arith.constant dense<0.000000e+00> : vector<4x128xf32>
    %35 = vector.multi_reduction <add>, %33, %cst_20 [1] : vector<4x128x128xf32> to vector<4x128xf32>
    %36 = vector.shape_cast %35 : vector<4x128xf32> to vector<4x1x128xf32>
    %37 = arith.addf %34, %36 : vector<4x1x128xf32>
    %cst_21 = arith.constant dense<0.000000e+00> : vector<4x8x128xf32>
    %38 = tpu.matmul %15, %33, %cst_21 {dimension_numbers = #tpu.dot_dimension_numbers<[2], [1], [1], [2], [0, 0, 0, 1, 1, 2], [0], [0]>} : vector<4x8x128xf32>, vector<4x128x128xf32>, vector<4x8x128xf32> -> vector<4x8x128xf32>
    %39 = vector.broadcast %30 : vector<4x1x128xf32> to vector<4x8x128xf32>
    %40 = arith.mulf %39, %13 : vector<4x8x128xf32>
    %41 = arith.addf %40, %38 : vector<4x8x128xf32>
    %42 = tpu.reciprocal %37 {approx = true} : vector<4x1x128xf32> -> vector<4x1x128xf32>
    %43 = vector.broadcast %42 : vector<4x1x128xf32> to vector<4x8x128xf32>
    %44 = arith.mulf %41, %43 : vector<4x8x128xf32>
    %45 = vector.shape_cast %44 : vector<4x8x128xf32> to vector<32x128xf32>
    %c0_22 = arith.constant 0 : index
    %c0_23 = arith.constant 0 : index
    %46 = vector.load %arg11[%c0_22, %c0_23] : memref<32x32xf32, #tpu.memory_space<vmem>>, vector<32x32xf32>
    %cst_24 = arith.constant dense<0.000000e+00> : vector<32x128xf32>
    %47 = tpu.matmul %46, %45, %cst_24 {dimension_numbers = #tpu.dot_dimension_numbers<[1], [0], [0], [1], [0, 0, 1, 1], [], []>} : vector<32x32xf32>, vector<32x128xf32>, vector<32x128xf32> -> vector<32x128xf32>
    %c0_25 = arith.constant 0 : index
    %c0_26 = arith.constant 0 : index
    %48 = vector.load %arg12[%c0_25, %c0_26] : memref<32x1xf32, #tpu.memory_space<vmem>>, vector<32x1xf32>
    %49 = vector.broadcast %48 : vector<32x1xf32> to vector<32x128xf32>
    %50 = arith.addf %47, %49 : vector<32x128xf32>
    %c0_27 = arith.constant 0 : index
    %c0_28 = arith.constant 0 : index
    %c0_29 = arith.constant 0 : index
    %51 = vector.load %arg13[%c0_27, %c0_28, %c0_29] : memref<1x32x128xf32, #tpu.memory_space<vmem>>, vector<1x32x128xf32>
    %52 = vector.shape_cast %51 : vector<1x32x128xf32> to vector<32x128xf32>
    %53 = vector.shape_cast %50 : vector<32x128xf32> to vector<1x32x128xf32>
    tpu.vector_store %arg13[%c0_27, %c0_28, %c0_29], %53 {strides = array<i32>} : memref<1x32x128xf32, #tpu.memory_space<vmem>>, vector<1x32x128xf32>,
    return
  }
  func.func @transform_0(%arg0: i32, %arg1: i32) -> (i32, i32, i32) {
    %c0_i32 = arith.constant 0 : i32
    %c0_i32_0 = arith.constant 0 : i32
    return %arg0, %c0_i32, %arg1 : i32, i32, i32
  }
  func.func @transform_1(%arg0: i32, %arg1: i32) -> (i32, i32, i32) {
    %c0_i32 = arith.constant 0 : i32
    %c0_i32_0 = arith.constant 0 : i32
    %c0_i32_1 = arith.constant 0 : i32
    return %arg0, %c0_i32, %c0_i32_0 : i32, i32, i32
  }
  func.func @transform_2(%arg0: i32, %arg1: i32) -> (i32, i32, i32) {
    %c0_i32 = arith.constant 0 : i32
    %c0_i32_0 = arith.constant 0 : i32
    %c0_i32_1 = arith.constant 0 : i32
    return %arg0, %c0_i32, %c0_i32_0 : i32, i32, i32
  }
  func.func @transform_3(%arg0: i32, %arg1: i32) -> (i32, i32) {
    %c0_i32 = arith.constant 0 : i32
    %c0_i32_0 = arith.constant 0 : i32
    %c0_i32_1 = arith.constant 0 : i32
    return %c0_i32, %c0_i32_0 : i32, i32
  }
  func.func @transform_4(%arg0: i32, %arg1: i32) -> (i32, i32) {
    %c0_i32 = arith.constant 0 : i32
    %c0_i32_0 = arith.constant 0 : i32
    %c0_i32_1 = arith.constant 0 : i32
    return %c0_i32, %c0_i32_0 : i32, i32
  }
  func.func @transform_5(%arg0: i32, %arg1: i32) -> (i32, i32) {
    %c0_i32 = arith.constant 0 : i32
    %c0_i32_0 = arith.constant 0 : i32
    %c0_i32_1 = arith.constant 0 : i32
    return %c0_i32, %c0_i32_0 : i32, i32
  }
  func.func @transform_6(%arg0: i32, %arg1: i32) -> (i32, i32) {
    %c0_i32 = arith.constant 0 : i32
    %c0_i32_0 = arith.constant 0 : i32
    %c0_i32_1 = arith.constant 0 : i32
    return %c0_i32, %c0_i32_0 : i32, i32
  }
  func.func @transform_7(%arg0: i32, %arg1: i32) -> (i32, i32) {
    %c0_i32 = arith.constant 0 : i32
    %c0_i32_0 = arith.constant 0 : i32
    %c0_i32_1 = arith.constant 0 : i32
    return %c0_i32, %c0_i32_0 : i32, i32
  }
  func.func @transform_8(%arg0: i32, %arg1: i32) -> (i32, i32) {
    %c0_i32 = arith.constant 0 : i32
    %c0_i32_0 = arith.constant 0 : i32
    %c0_i32_1 = arith.constant 0 : i32
    return %c0_i32, %c0_i32_0 : i32, i32
  }
  func.func @transform_9(%arg0: i32, %arg1: i32) -> (i32, i32) {
    %c0_i32 = arith.constant 0 : i32
    %c0_i32_0 = arith.constant 0 : i32
    %c0_i32_1 = arith.constant 0 : i32
    return %c0_i32, %c0_i32_0 : i32, i32
  }
  func.func @transform_10(%arg0: i32, %arg1: i32) -> (i32, i32) {
    %c0_i32 = arith.constant 0 : i32
    %c0_i32_0 = arith.constant 0 : i32
    %c0_i32_1 = arith.constant 0 : i32
    return %c0_i32, %c0_i32_0 : i32, i32
  }
  func.func @transform_11(%arg0: i32, %arg1: i32) -> (i32, i32, i32) {
    %c0_i32 = arith.constant 0 : i32
    %c0_i32_0 = arith.constant 0 : i32
    return %arg0, %c0_i32, %arg1 : i32, i32, i32
  }
}

</mosaic_0001>

<bundles_post_ra>
// kernel: tpu_custom_call.1
= control target key start
LH: loop header
LB: loop body
LE: loop exit
PB: predicated region body
PF: predicated region fallthrough
CT: control target
= control target key end

     0   :  { %s4700_s0 = inlined_call_operand.vmem [shape: f32[2,32,128], index: 0, kind: input, shape index: {}]   ;;  %s4701_s1 = inlined_call_operand.vmem [shape: f32[2,32,128], index: 1, kind: input, shape index: {}]   ;;  %s4702_s2 = inlined_call_operand.hbm [shape: f32[2,32,128], index: 2, kind: input, shape index: {}]   ;;  %s4703_s3 = inlined_call_operand.hbm [shape: f32[32,32], index: 3, kind: input, shape index: {}]   ;;  %s4704_s4 = inlined_call_operand.vmem [shape: f32[32,1], index: 4, kind: input, shape index: {}]   ;;  %s4705_s5 = inlined_call_operand.hbm [shape: f32[32,32], index: 5, kind: input, shape index: {}]   ;;  %s4706_s6 = inlined_call_operand.vmem [shape: f32[32,1], index: 6, kind: input, shape index: {}]   ;;  %s4707_s7 = inlined_call_operand.hbm [shape: f32[32,32], index: 7, kind: input, shape index: {}]   ;;  %s4708_s8 = inlined_call_operand.vmem [shape: f32[32,1], index: 8, kind: input, shape index: {}]   ;;  %s4709_s9 = inlined_call_operand.vmem [shape: f32[32,32], index: 9, kind: input, shape index: {}]   ;;  %s4710_s10 = inlined_call_operand.vmem [shape: f32[32,1], index: 10, kind: input, shape index: {}]   ;;  %s4711_s11 = inlined_call_operand.hbm [shape: f32[2,32,128], index: 11, kind: output, shape index: {}]  }
   0x1   :  { %4724 = sst [smem:[#allocation19_spill]] %s4704_s4 }
   0x2   :  { %4725 = sst [smem:[#allocation20_spill]] %s4706_s6 }
   0x3   :  { %4726 = sst [smem:[#allocation21_spill]] %s4708_s8 }
   0x4   :  { %4727 = sst [smem:[#allocation22_spill]] %s4709_s9 }
   0x5   :  { %4728 = sst [smem:[#allocation23_spill]] %s4710_s10 }
   0x6   :  { %4729 = sst [smem:[#allocation24_spill]] %s4711_s11 }
   0x7   :  { %16 = vsyncpa [#allocation5], 0 }
   0x8   :  { %18 = vsyncpa [#allocation5 + $0x1], 0 }
   0x9   :  { %19 = vsyncpa [#allocation8], 0 }
   0xa   :  { %20 = vsyncpa [#allocation11], 0 }
   0xb   :  { %21 = vsyncpa [#allocation6], 0 }
   0xc   :  { %23 = vsyncpa [#allocation6 + $0x1], 0  ;;  %s4038_s17 = smov 0   ;;  %s4040_s18 = smov 0  }
   0xd   :  { %s4042_s19 = smov 0   ;;  %s4044_s20 = smov 0  }
   0xe   :  { %s4046_s21 = smov 0   ;;  %s4048_s22 = smov 0  }
   0xf LB: > { %4730 = sst [smem:[#allocation17_spill]] %s3943_s17  ;;  %s2911_s23 = sadd.s32 4294967295, %s3963_s22   ;;  %s3963_s22 = sphi %s4048_s22, %s29_s22   ;;  %s3959_s21 = sphi %s4046_s21, %s4759_s21   ;;  %s3955_s20 = sphi %s4044_s20, %s4758_s20   ;;  %s3951_s19 = sphi %s4042_s19, %s4757_s19   ;;  %s3947_s18 = sphi %s4040_s18, %s4756_s18   ;;  %s3943_s17 = sphi %s4038_s17, %s4755_s17  }
  0x10   : > { %s2912_s24 = sadd.s32 4294967294, %s3963_s22   ;;  %p115_p0 = scmp.ne.s32.totalorder %s3947_s18, %s3943_s17 }
  0x11   : > { %p4072_p1 = scmp.eq.s32.totalorder %s2911_s23, 0  ;;  %p4076_p2 = scmp.eq.s32.totalorder %s2911_s23, 1 }
  0x12   : > { %p315_p3 = scmp.eq.s32.totalorder %s2912_s24, 1  ;;  %p2913_p5 = scmp.ge.s32.totalorder %s3963_s22, 1 }
  0x13   : > { %s4731_s25 = scalar_select %p4072_p1, 1, 0 }
  0x14   : > { %s4732_s26 = scalar_select %p4076_p2, 1, 0 }
  0x15   : > { %p4082_p4 = por %p4072_p1, %p115_p0  ;;  %p4087_p6 = por %p315_p3, %p115_p0 }
  0x16   : > { %p322_p7 = scmp.lt.s32.totalorder %s3963_s22, 3  ;;  %s3965_s30 = smov [#allocation7]  }
  0x17   : > { %s4733_s27 = scalar_select %p4082_p4, 1, 0 }
  0x18   : > { %s4734_s28 = scalar_select %p4087_p6, 1, 0 }
  0x19   : > { %p4092_p8 = pnand %p2913_p5, %p322_p7  ;;  %s334_s12 = sshll.u32 %s3965_s30, 4  ;;  %s4096_s12 = int_to_ptr.vmem [resolvable:$true] %s334_s12 }
  0x1a   : > { %4735 = sst [smem:[#allocation18_spill]] %s4734_s28  ;;  %s3966_s14 = smov [#allocation9]  }
  0x1b   : > { %s4736_s29 = scalar_select %p4092_p8, 1, 0 }
  0x1c   : > { %p3632_p9 = pneg %p4092_p8  ;;  %s350_s15 = sshll.u32 %s3966_s14, 4  ;;  %s4107_s15 = int_to_ptr.vmem [resolvable:$true] %s350_s15 }
  0x1d   : > { %s3967_s16 = smov [#allocation10]   ;;  %s3759_s28 = scalar_lea.hbm %s4703_s3, 512 }
  0x1e   : > { %p4103_p11 = pnand %p3632_p9, %p4072_p1  ;;  %s4109_s23 = sshll.u32 %s3967_s16, 4  ;;  %s367_s23 = int_to_ptr.vmem [resolvable:$true] %s4109_s23 }
  0x1f   : > { %p3760_p12 = scmp.ne.s32.totalorder %s4703_s3, %s3759_s28  ;;  %p3766_p5 = scmp.lt.u32.totalorder %s3759_s28, %s4703_s3 }
  0x20   : > { %p4119_p13 = pneg %p4103_p11 }
  0x22   : > { %p3762_p0 = pnand %p4119_p13, %p3760_p12 }
  0x24   : > { %p3763_p3 = pneg %p3762_p0 }
  0x26   : > { %p3768_p7 = pnand %p3766_p5, %p3763_p3 }
  0x28   : > { %3771 = shalt.err (!%p3768_p7)
}
  0x29   : > { %s3772_s11 = scalar_lea.vmem %s4096_s12, 512  ;;  %p3780_p1 = scmp.lt.s32.totalorder %s4096_s12, %s4096_s12 }
  0x2a   : > { %p3773_p9 = scmp.ne.s32.totalorder %s4096_s12, %s3772_s11  ;;  %p3781_p4 = scmp.lt.s32.totalorder %s3772_s11, %s3772_s11 }
  0x2c   : > { %p3775_p10 = pnand %p3773_p9, %p4119_p13  ;;  %p3782_p12 = por %p3781_p4, %p3780_p1 }
  0x2e   : > { %p3776_p6 = pneg %p3775_p10 }
  0x30   : > { %p3783_p0 = pnand %p3782_p12, %p3776_p6 }
  0x32   : > { %3786 = shalt.err (!%p3783_p0)
}
  0x33   : > { %s3968_s17 = smov 128   ;;  %s3969_s28 = smov 8  }
  0x34   : > { %3635 = dma.hbm_to_vmem [thread:$0]  (!%p4103_p11), %s4703_s3, 512, %s4096_s12, [#allocation8], %s3968_s17, %s3968_s17, %s3969_s28  }
  0x35   : > { %s3787_s11 = scalar_lea.hbm %s4705_s5, 512 }
  0x36   : > { %p3788_p1 = scmp.ne.s32.totalorder %s4705_s5, %s3787_s11  ;;  %p3794_p10 = scmp.lt.u32.totalorder %s3787_s11, %s4705_s5 }
  0x38   : > { %p3790_p4 = pnand %p3788_p1, %p4119_p13 }
  0x3a   : > { %p3791_p6 = pneg %p3790_p4 }
  0x3c   : > { %p3796_p3 = pnand %p3794_p10, %p3791_p6 }
  0x3e   : > { %3799 = shalt.err (!%p3796_p3)
}
  0x3f   : > { %s3800_s12 = scalar_lea.vmem %s4107_s15, 512  ;;  %p3808_p12 = scmp.lt.s32.totalorder %s4107_s15, %s4107_s15 }
  0x40   : > { %p3801_p5 = scmp.ne.s32.totalorder %s4107_s15, %s3800_s12  ;;  %p3809_p0 = scmp.lt.s32.totalorder %s3800_s12, %s3800_s12 }
  0x42   : > { %p3803_p7 = pnand %p3801_p5, %p4119_p13  ;;  %p3810_p1 = por %p3809_p0, %p3808_p12 }
  0x44   : > { %p3804_p9 = pneg %p3803_p7 }
  0x46   : > { %p3811_p4 = pnand %p3810_p1, %p3804_p9 }
  0x48   : > { %3814 = shalt.err (!%p3811_p4)
}
  0x49   : > { %3638 = dma.hbm_to_vmem [thread:$0]  (!%p4103_p11), %s4705_s5, 512, %s4107_s15, [#allocation8], %s3968_s17, %s3968_s17, %s3969_s28  }
  0x4a   : > { %s3815_s24 = scalar_lea.hbm %s4707_s7, 512 }
  0x4b   : > { %p3816_p6 = scmp.ne.s32.totalorder %s4707_s7, %s3815_s24  ;;  %p3822_p5 = scmp.lt.u32.totalorder %s3815_s24, %s4707_s7 }
  0x4d   : > { %p3818_p10 = pnand %p3816_p6, %p4119_p13 }
  0x4f   : > { %p3819_p3 = pneg %p3818_p10 }
  0x51   : > { %p3824_p7 = pnand %p3822_p5, %p3819_p3 }
  0x53   : > { %3827 = shalt.err (!%p3824_p7)
}
  0x54   : > { %s3828_s12 = scalar_lea.vmem %s367_s23, 512  ;;  %p3836_p1 = scmp.lt.s32.totalorder %s367_s23, %s367_s23 }
  0x55   : > { %p3829_p9 = scmp.ne.s32.totalorder %s367_s23, %s3828_s12  ;;  %p3837_p4 = scmp.lt.s32.totalorder %s3828_s12, %s3828_s12 }
  0x57   : > { %p3831_p12 = pnand %p3829_p9, %p4119_p13  ;;  %p3838_p8 = por %p3837_p4, %p3836_p1 }
  0x59   : > { %p3832_p0 = pneg %p3831_p12 }
  0x5b   : > { %p3839_p2 = pnand %p3838_p8, %p3832_p0 }
  0x5d   : > { %3842 = shalt.err (!%p3839_p2)
}
  0x5e   : > { %3641 = dma.hbm_to_vmem [thread:$0]  (!%p4103_p11), %s4707_s7, 512, %s367_s23, [#allocation11], %s3968_s17, %s3968_s17, %s3969_s28  }
  0x5f   : > { %s102_s9 = sadd.s32 1, %s3951_s19  ;;  %s41_s13 = sadd.s32 1, %s3959_s21 }
  0x60   : > { %p109_p2 = scmp.ne.s32.totalorder %s3951_s19, %s3947_s18  ;;  %p43_p8 = scmp.ge.s32.totalorder %s41_s13, 2 }
  0x61   : > { %p110_p13 = scmp.eq.s32.totalorder %s3963_s22, 0  ;;  %p4739_p6 = scmp.ne.s32.totalorder %s4732_s26, 0 }
  0x62   : > { %p3653_p3 = scmp.lt.s32.totalorder %s3963_s22, 2  ;;  %s4761_s13 = smov (%p43_p8, %s41_s13), 0 }
  0x63   : > { %p4198_p10 = por %p4739_p6, %p109_p2  ;;  %p111_p5 = por %p110_p13, %p109_p2 }
  0x64   : > { %s408_s8 = sand.u32 1, %s3951_s19   ;;  %s99_s10 = ssub.s32 %s3959_s21, %s4761_s13 }
  0x65   : > { %p100_p7 = scmp.eq.s32.totalorder %s99_s10, 0  ;;  %s2918_s23 = sshll.u32 %s408_s8, 5 }
  0x66   : > { %s3016_s24 = sshll.u32 %s3959_s21, 9  ;;  %s412_s11 = scalar_lea.vmem [#allocation4], %s2918_s23 }
  0x67   : > { %s4210_s30 = scalar_select %p100_p7, %s3951_s19, %s102_s9  }
  0x68   : > { %s4215_s26 = scalar_lea.hbm %s4702_s2, %s3016_s24  ;;  %s419_s12 = sshll.u32 %s412_s11, 4  ;;  %s4217_s12 = int_to_ptr.vmem [resolvable:$true] %s419_s12 }
  0x69   : > { %p4221_p11 = pnand %p3653_p3, %p111_p5  ;;  %s4225_s4 = scalar_lea.sflag [#allocation5], %s408_s8 }
  0x6a   : > { %s3843_s9 = scalar_lea.hbm %s4215_s26, 512  ;;  %s3848_s24 = scalar_lea.hbm %s4702_s2, 1024 }
  0x6b   : > { %p3844_p9 = scmp.ne.s32.totalorder %s4215_s26, %s3843_s9  ;;  %p3845_p12 = pneg %p4221_p11 }
  0x6c   : > { %p3849_p4 = scmp.lt.u32.totalorder %s4215_s26, %s4702_s2  ;;  %p3850_p2 = scmp.lt.u32.totalorder %s3848_s24, %s3843_s9 }
  0x6d   : > { %p3846_p0 = pnand %p3845_p12, %p3844_p9  ;;  %p3852_p13 = scmp.lt.u32.totalorder %s3843_s9, %s4215_s26 }
  0x6e   : > { %p3851_p8 = por %p3850_p2, %p3849_p4 }
  0x6f   : > { %p3847_p1 = pneg %p3846_p0 }
  0x70   : > { %p3853_p6 = por %p3852_p13, %p3851_p8 }
  0x72   : > { %p3854_p3 = pnand %p3853_p6, %p3847_p1 }
  0x74   : > { %3857 = shalt.err (!%p3854_p3)
}
  0x75   : > { %s3858_s8 = scalar_lea.vmem %s4217_s12, 512  ;;  %s3970_s11 = smov [#allocation4]  }
  0x76   : > { %p3859_p5 = scmp.ne.s32.totalorder %s4217_s12, %s3858_s8  ;;  %s3863_s10 = sshll.u32 %s3970_s11, 4  ;;  %s3864_s10 = int_to_ptr.vmem [resolvable:$false] %s3863_s10 }
  0x77   : > { %s3865_s23 = scalar_lea.vmem %s3864_s10, 1024  ;;  %p3866_p0 = scmp.lt.s32.totalorder %s4217_s12, %s3864_s10 }
  0x78   : > { %p3861_p7 = pnand %p3859_p5, %p3845_p12  ;;  %p3867_p4 = scmp.lt.s32.totalorder %s3865_s23, %s3858_s8 }
  0x7a   : > { %p3862_p9 = pneg %p3861_p7  ;;  %p3868_p2 = por %p3867_p4, %p3866_p0 }
  0x7c   : > { %p3869_p8 = pnand %p3868_p2, %p3862_p9 }
  0x7e   : > { %3872 = shalt.err (!%p3869_p8)
}
  0x7f   : > { %3645 = dma.hbm_to_vmem [thread:$0]  (!%p4221_p11), %s4215_s26, 512, %s4217_s12, %s4225_s4, %s3968_s17, %s3968_s17, %s3969_s28  }
  0x80   : > { %p4742_p12 = scmp.ne.s32.totalorder %s4736_s29, 0 }
  0x81   : > { %s4259_s9 = sand.u32 (!%p4742_p12), 1, %s3947_s18   ;;  %p4743_p1 = scmp.ne.s32.totalorder (!%p4742_p12), %s4733_s27, 0 }
  0x82   : > { %431 = sbr.rel (%p4742_p12) target bundleno = 1334 (0x536), region = 64  ;;  %s2922_s24 = sshll.u32 (!%p4742_p12), %s4259_s9, 5 }
  0x83   : > { %s434_s14 = scalar_lea.sflag (!%p4742_p12), [#allocation5], %s4259_s9  ;;  %s4265_s15 = scalar_lea.vmem (!%p4742_p12), [#allocation4], %s2922_s24 }
  0x89   : > { %3926 = dma.done.wait (%p4743_p1), %s434_s14, 512  }
  0x8a   : > { %3928 = vsyncadd (%p4743_p1), %s434_s14, 4294966784  ;;  %p4744_p11 = scmp.ne.s32.totalorder %s4731_s25, 0 }
  0x8c   : > { %3930 = dma.done.wait (%p4744_p11), [#allocation8], 1024  }
  0x8d   : > { %3932 = vsyncadd (%p4744_p11), [#allocation8], 4294966272 }
  0x8e   : > { %3934 = dma.done.wait (%p4744_p11), [#allocation11], 512  }
  0x8f   : > { %3936 = vsyncadd (%p4744_p11), [#allocation11], 4294966784  ;;  %p501_p13 = scmp.lt.s32.totalorder %s3955_s20, 1  ;;  %v3971_v0 = vmov 0   ;;  %vm550_vm0 = vcmask 261120   ;;  %v518_v6 = vld [vmem:[#allocation9] sm:$0xff] }
  0x90   : > { %3717 = vset.pattern.permute.xlu0 %v3971_v0  ;;  %3718 = vset.pattern.permute.xlu1 %v3971_v0  ;;  %s4745_s11 = sld [smem:[#allocation20_spill]]  ;;  %v519_v16 = vld [vmem:[#allocation9 + $0x8] sm:$0xff]  ;;  %v520_v18 = vld [vmem:[#allocation9 + $0x10] sm:$0xff]  ;;  %s4746_s12 = sld [smem:[#allocation19_spill]]  ;;  %v521_v21 = vld [vmem:[#allocation9 + $0x18] sm:$0xff]  ;;  %vm955_vm1 = vcmask 64512  }
  0x91   : > { %s502_s27 = scalar_select %p501_p13, %s3955_s20, 1  ;;  %3196 = vmatprep.mubr.msk.f32.mxu0 %vm550_vm0, %v518_v6  ;;  %v785_v23 = vld [vmem:[#allocation7] sm:$0xff]  ;;  %v786_v25 = vld [vmem:[#allocation7 + $0x8] sm:$0xff]  ;;  %v787_v27 = vld [vmem:[#allocation7 + $0x10] sm:$0xff]  ;;  %vm3973_vm2 = vmmov 0  }
  0x92   : > { %v788_v28 = vld [vmem:[#allocation7 + $0x18] sm:$0xff]  ;;  %v652_v29 = vld [vmem:[%s4265_s15] sm:$0xff]  ;;  %v653_v30 = vld [vmem:[%s4265_s15 + $0x8] sm:$0xff]  ;;  %s4748_s4 = sld [smem:[#allocation23_spill]]  ;;  %s4749_s25 = sld [smem:[#allocation22_spill]] }
  0x93   : > { %s3017_s29 = sshll.u32 %s502_s27, 5  ;;  %v3496_v31 = vpack.c.bf16 %v653_v30, %v652_v29  ;;  %v654_v32 = vld [vmem:[%s4265_s15 + $0x10] sm:$0xff]  ;;  %v655_v33 = vld [vmem:[%s4265_s15 + $0x18] sm:$0xff]  ;;  %v648_v35 = vld [vmem:[#allocation10] sm:$0xff]  ;;  %s4747_s27 = sld [smem:[#allocation21_spill]] }
  0x94   : > { %s513_s26 = scalar_lea.vmem %s4701_s1, %s3017_s29  ;;  %s508_s16 = scalar_lea.vmem %s4700_s0, %s3017_s29  ;;  %v3500_v34 = vpack.c.bf16 %v655_v33, %v654_v32  ;;  %3210 = vmatprep.mubr.msk.f32.mxu1 %vm550_vm0, %v648_v35  ;;  %v649_v36 = vld [vmem:[#allocation10 + $0x8] sm:$0xff]  ;;  %v650_v37 = vld [vmem:[#allocation10 + $0x10] sm:$0xff]  ;;  %v651_v38 = vld [vmem:[#allocation10 + $0x18] sm:$0xff] }
  0x95   : > { %v522_v1 = vld [vmem:[%s513_s26] sm:$0xff]  ;;  %v523_v2 = vld [vmem:[%s513_s26 + $0x8] sm:$0xff]  ;;  %v524_v3 = vld [vmem:[%s513_s26 + $0x10] sm:$0xff]  ;;  %3497 = vmatprep.subr.bf16.mxu1 %v3496_v31  ;;  %s500_s17 = scalar_lea.vmem [#allocation12], %s2922_s24  ;;  %s4750_s8 = sld [smem:[#allocation24_spill]] }
  0x96   : > { %v3488_v4 = vpack.c.bf16 %v523_v2, %v522_v1  ;;  %v525_v5 = vld [vmem:[%s513_s26 + $0x18] sm:$0xff]  ;;  %v789_v8 = vld [vmem:[%s508_s16] sm:$0xff]  ;;  %v790_v9 = vld [vmem:[%s508_s16 + $0x8] sm:$0xff]  ;;  %3499 = vmatpush3.bf16.msra.mxu1 %v3496_v31  ;;  %s2769_s28 = sshll.u32 %s500_s17, 4  ;;  %s3019_s26 = sshll.u32 %s3955_s20, 9  ;;  %s4646_s28 = int_to_ptr.vmem [resolvable:$true] %s2769_s28 }
  0x97   : > { %v3492_v7 = vpack.c.bf16 %v525_v5, %v524_v3  ;;  %v3504_v10 = vpack.c.bf16 %v790_v9, %v789_v8  ;;  %v526_v11 = vld [vmem:[%s4745_s11] sm:$0xff]  ;;  %v791_v12 = vld [vmem:[%s508_s16 + $0x10] sm:$0xff]  ;;  %v792_v13 = vld [vmem:[%s508_s16 + $0x18] sm:$0xff]  ;;  %3501 = vmatprep.subr.bf16.mxu1 %v3500_v34  ;;  %s2755_s20 = scalar_lea.sflag [#allocation6], %s4259_s9  ;;  %s3873_s23 = scalar_lea.vmem %s4646_s28, 512 }
  0x98   : > { %3489 = vmatprep.subr.bf16.mxu0 %v3488_v4  ;;  %532 = vperm.xlu0 %3717, %v526_v11   ;;  %v528_v14 = vld [vmem:[%s4745_s11 + $0x10] sm:$0xff]  ;;  %v527_v15 = vld [vmem:[%s4745_s11 + $0x8] sm:$0xff]  ;;  %v529_v17 = vld [vmem:[%s4745_s11 + $0x18] sm:$0xff]  ;;  %v3508_v19 = vpack.c.bf16 %v792_v13, %v791_v12  ;;  %p3874_p6 = scmp.ne.s32.totalorder %s4646_s28, %s3873_s23  ;;  %s3975_s15 = smov [#allocation12]  }
  0x99   : > { %3491 = vmatpush3.bf16.msra.mxu0 %v3488_v4  ;;  %542 = vperm.xlu1 %3718, %v528_v14   ;;  %v793_v20 = vld [vmem:[%s4746_s12] sm:$0xff]  ;;  %v794_v22 = vld [vmem:[%s4746_s12 + $0x8] sm:$0xff]  ;;  %v795_v24 = vld [vmem:[%s4746_s12 + $0x10] sm:$0xff]  ;;  %s3877_s14 = sshll.u32 %s3975_s15, 4  ;;  %s3878_s14 = int_to_ptr.vmem [resolvable:$false] %s3877_s14 }
  0x9a   : > { %3493 = vmatprep.subr.bf16.mxu0 %v3492_v7  ;;  %v796_v26 = vld [vmem:[%s4746_s12 + $0x18] sm:$0xff]  ;;  %3503 = vmatpush3.bf16.msra.mxu1 %v3500_v34  ;;  %v657_v11 = vld [vmem:[%s4747_s27 + $0x8] sm:$0xff]  ;;  %v2629_v30 = vld [vmem:[%s4748_s4] sm:$0xff]  ;;  %p3875_p3 = pnand %p3874_p6, %p4198_p10  ;;  %s3879_s29 = scalar_lea.vmem %s3878_s14, 1024 }
  0x9b   : > { %v2631_v33 = vld [vmem:[%s4748_s4 + $0x10] sm:$0xff]  ;;  %s4651_s10 = scalar_lea.hbm %s4750_s8, %s3019_s26  ;;  %p3880_p7 = scmp.lt.s32.totalorder %s4646_s28, %s3878_s14 }
  0x9c   : > { %537 = vperm.xlu0 %3717, %v527_v15   ;;  %v659_v15 = vld [vmem:[%s4747_s27 + $0x18] sm:$0xff]  ;;  %p3876_p5 = pneg %p3875_p3  ;;  %p3881_p9 = scmp.lt.s32.totalorder %s3879_s29, %s3873_s23 }
  0x9d   : > { %3495 = vmatpush3.bf16.msra.mxu0 %v3492_v7  ;;  %547 = vperm.xlu1 %3718, %v529_v17  }
  0x9e   : > { %3505 = vmatprep.subr.bf16.mxu0 %v3504_v10  ;;  %3211 = vmatmul.mubr.msk.f32.vlgmr.msra.gmra.mrb[0].mxu1 %vm550_vm0, %v649_v36  ;;  %p3882_p0 = por %p3881_p9, %p3880_p7 }
  0x9f   : > { %3213 = vmatprep.mubr.msk.f32.mxu1 %vm550_vm0, %v650_v37 }
  0xa0   : > { %3197 = vmatmul.mubr.msk.f32.vlgmr.msra.gmra.mrb[0].mxu0 %vm550_vm0, %v519_v16  ;;  %799 = vperm.xlu0 %3717, %v793_v20   ;;  %p3883_p4 = pnand %p3882_p0, %p3876_p5 }
  0xa1   : > { %3507 = vmatpush3.bf16.msra.mxu0 %v3504_v10  ;;  %3199 = vmatprep.mubr.msk.f32.mxu0 %vm550_vm0, %v520_v18 }
  0xa2   : > { %3509 = vmatprep.subr.bf16.mxu0 %v3508_v19  ;;  %804 = vperm.xlu1 %3718, %v794_v22   ;;  %v2632_v22 = vld [vmem:[%s4748_s4 + $0x18] sm:$0xff] }
  0xa3   : > { %3214 = vmatmul.mubr.msk.f32.gmra.mrb[2].mxu1 %vm550_vm0, %v651_v38 }
  0xa4   : > { %3200 = vmatmul.mubr.msk.f32.gmra.mrb[2].mxu0 %vm550_vm0, %v521_v21  ;;  %809 = vperm.xlu0 %3717, %v795_v24  }
  0xa5   : > { %3511 = vmatpush3.bf16.msra.mxu0 %v3508_v19  ;;  %3224 = vmatprep.mubr.msk.f32.mxu0 %vm550_vm0, %v785_v23  ;;  %v2630_v19 = vld [vmem:[%s4748_s4 + $0x8] sm:$0xff]  ;;  %v656_v23 = vld [vmem:[%s4747_s27] sm:$0xff] }
  0xa6   : > { %814 = vperm.xlu1 %3718, %v796_v26  }
  0xa8   : > { %3225 = vmatmul.mubr.msk.f32.vlgmr.msra.gmra.mrb[4].mxu0 %vm550_vm0, %v786_v25 }
  0xa9   : > { %3227 = vmatprep.mubr.msk.f32.mxu0 %vm550_vm0, %v787_v27  ;;  %v658_v27 = vld [vmem:[%s4747_s27 + $0x10] sm:$0xff] }
  0xac   : > { %3228 = vmatmul.mubr.msk.f32.gmra.mrb[6].mxu0 %vm550_vm0, %v788_v28 }
 0x117   : > { %v533_v40 = vpop.permute.xlu0 %532 }
 0x118   : > { %v543_v39 = vpop.permute.xlu1 %542 }
 0x11b   : > { %v538_v42 = vpop.permute.xlu0 %537 }
 0x11c   : > { %v548_v41 = vpop.permute.xlu1 %547 }
 0x11f   : > { %v800_v50 = vpop.permute.xlu0 %799 }
 0x121   : > { %v805_v48 = vpop.permute.xlu1 %804 }
 0x123   : > { %v810_v57 = vpop.permute.xlu0 %809 }
 0x125   : > { %v815_v55 = vpop.permute.xlu1 %814 }
 0x171   : > { %v4327_v63 = vpop.f32.mrb[0].mxu1 }
 0x172   : > { %v4344_v13 = vpop.f32.mrb[1].mxu1 }
 0x173   : > { %v3198_v43 = vpop.f32.mrb[0].mxu0 }
 0x174   : > { %v635_v44 = vadd.f32 %v3198_v43, %v538_v42  ;;  %v629_v45 = vpop.f32.mrb[1].mxu0 }
 0x175   : > { %v630_v46 = vadd.f32 %v629_v45, %v533_v40 }
 0x176   : > { %1149 = vxpose.xlu1.b32.start.end [1/1] (short) %v635_v44, 128  ;;  %v4349_v16 = vpop.f32.mrb[2].mxu1 }
 0x177   : > { %923 = vxpose.xlu0.b32.start.end [1/1] (short) %v630_v46, 128  ;;  %v3201_v47 = vpop.f32.mrb[2].mxu0  ;;  %v4366_v25 = vpop.f32.mrb[3].mxu1 }
 0x178   : > { %v639_v49 = vpop.f32.mrb[3].mxu0  ;;  %v645_v61 = vadd.f32 %v3201_v47, %v548_v41 }
 0x179   : > { %v640_v62 = vadd.f32 %v639_v49, %v543_v39 }
 0x17b   : > { %v3226_v51 = vpop.f32.mrb[4].mxu0 }
 0x17c   : > { %v896_v52 = vpop.f32.mrb[5].mxu0  ;;  %v902_v53 = vadd.f32 %v3226_v51, %v805_v48 }
 0x17d   : > { %v897_v54 = vadd.f32 %v896_v52, %v800_v50 }
 0x17e   : > { %3256 = vmatprep.subr.mxu0 %v902_v53 }
 0x17f   : > { %v3229_v56 = vpop.f32.mrb[6].mxu0  ;;  %3230 = vmatprep.subr.mxu1 %v897_v54  ;;  %3257 = vmatpush3.msra.mxu0 %v902_v53 }
 0x180   : > { %v906_v58 = vpop.f32.mrb[7].mxu0  ;;  %3231 = vmatpush3.msra.mxu1 %v897_v54  ;;  %v912_v59 = vadd.f32 %v3229_v56, %v815_v55 }
 0x181   : > { %v907_v60 = vadd.f32 %v906_v58, %v810_v57 }
 0x182   : > { %3308 = vmatprep.subr.mxu0 %v912_v59 }
 0x183   : > { %3282 = vmatprep.subr.mxu1 %v907_v60 }
 0x1b3   : > { %1599 = vxpose.xlu1.b32.start.end [1/1] (short) %v645_v61, 128 }
 0x1b4   : > { %1374 = vxpose.xlu0.b32.start.end [1/1] (short) %v640_v62, 128 }
 0x1f6   : > { %v1165_v0 = vpop.trf.xlu1 }
 0x1f7   : > { %v939_v1 = vpop.trf.xlu0  ;;  %3258 = vmatprep.mubr.msk.f32.mxu0 %vm955_vm1, %v1165_v0 }
 0x1f8   : > { %3232 = vmatprep.mubr.msk.f32.mxu1 %vm955_vm1, %v939_v1 }
 0x1fa   : > { %v1166_v2 = vpop.trf.xlu1 }
 0x1fb   : > { %3259 = vmatmul.mubr.msk.f32.vlgmr.msra.gmra.mrb[8].mxu0 %vm955_vm1, %v1166_v2  ;;  %v940_v3 = vpop.trf.xlu0 }
 0x1fc   : > { %3309 = vmatpush3.msra.mxu0 %v912_v59  ;;  %3233 = vmatmul.mubr.msk.f32.vlgmr.msra.gmra.mrb[4].mxu1 %vm955_vm1, %v940_v3 }
 0x1fd   : > { %3283 = vmatpush3.msra.mxu1 %v907_v60 }
 0x1fe   : > { %v1167_v4 = vpop.trf.xlu1 }
 0x1ff   : > { %v941_v5 = vpop.trf.xlu0  ;;  %3261 = vmatprep.mubr.msk.f32.mxu0 %vm955_vm1, %v1167_v4 }
 0x200   : > { %3235 = vmatprep.mubr.msk.f32.mxu1 %vm955_vm1, %v941_v5 }
 0x202   : > { %v1168_v6 = vpop.trf.xlu1 }
 0x203   : > { %3262 = vmatmul.mubr.msk.f32.gmra.mrb[10].mxu0 %vm955_vm1, %v1168_v6  ;;  %v942_v7 = vpop.trf.xlu0 }
 0x204   : > { %3236 = vmatmul.mubr.msk.f32.gmra.mrb[6].mxu1 %vm955_vm1, %v942_v7 }
 0x206   : > { %v1169_v8 = vpop.trf.xlu1 }
 0x207   : > { %v943_v9 = vpop.trf.xlu0  ;;  %3264 = vmatprep.mubr.msk.f32.mxu0 %vm955_vm1, %v1169_v8 }
 0x208   : > { %3238 = vmatprep.mubr.msk.f32.mxu1 %vm955_vm1, %v943_v9 }
 0x20a   : > { %v1170_v10 = vpop.trf.xlu1 }
 0x20b   : > { %3265 = vmatmul.mubr.msk.f32.gmra.mrb[12].mxu0 %vm955_vm1, %v1170_v10  ;;  %v944_v12 = vpop.trf.xlu0 }
 0x20c   : > { %3239 = vmatmul.mubr.msk.f32.gmra.mrb[8].mxu1 %vm955_vm1, %v944_v12  ;;  %v3972_v12 = vmov 0.0|0.0  }
 0x20d   : > { %667 = vperm.xlu1 %3718, %v657_v11   ;;  %3536 = vmatprep.subr.bf16.mxu0 %v3972_v12 }
 0x20e   : > { %v1171_v14 = vpop.trf.xlu1  ;;  %3512 = vmatprep.subr.bf16.mxu1 %v3972_v12 }
 0x20f   : > { %v945_v17 = vpop.trf.xlu0  ;;  %3267 = vmatprep.mubr.msk.f32.mxu0 %vm955_vm1, %v1171_v14  ;;  %v3974_v14 = vmov 0.0  }
 0x210   : > { %3241 = vmatprep.mubr.msk.f32.mxu1 %vm955_vm1, %v945_v17 }
 0x211   : > { %677 = vperm.xlu1 %3718, %v659_v15  }
 0x212   : > { %v1172_v18 = vpop.trf.xlu1 }
 0x213   : > { %3268 = vmatmul.mubr.msk.f32.gmra.mrb[14].mxu0 %vm955_vm1, %v1172_v18  ;;  %v946_v20 = vpop.trf.xlu0 }
 0x214   : > { %3242 = vmatmul.mubr.msk.f32.gmra.mrb[10].mxu1 %vm955_vm1, %v946_v20 }
 0x215   : > { %2640 = vperm.xlu1 %3718, %v2630_v19  }
 0x216   : > { %v1173_v21 = vpop.trf.xlu1 }
 0x217   : > { %v947_v24 = vpop.trf.xlu0  ;;  %3270 = vmatprep.mubr.msk.f32.mxu0 %vm955_vm1, %v1173_v21 }
 0x218   : > { %3244 = vmatprep.mubr.msk.f32.mxu1 %vm955_vm1, %v947_v24 }
 0x219   : > { %2650 = vperm.xlu1 %3718, %v2632_v22   ;;  %662 = vperm.xlu0 %3717, %v656_v23  }
 0x21a   : > { %v1174_v26 = vpop.trf.xlu1 }
 0x21b   : > { %3271 = vmatmul.mubr.msk.f32.gmra.mrb[16].mxu0 %vm955_vm1, %v1174_v26  ;;  %v948_v28 = vpop.trf.xlu0 }
 0x21c   : > { %3245 = vmatmul.mubr.msk.f32.gmra.mrb[12].mxu1 %vm955_vm1, %v948_v28 }
 0x21d   : > { %672 = vperm.xlu0 %3717, %v658_v27  }
 0x21e   : > { %v1175_v29 = vpop.trf.xlu1 }
 0x21f   : > { %v949_v31 = vpop.trf.xlu0  ;;  %3273 = vmatprep.mubr.msk.f32.mxu0 %vm955_vm1, %v1175_v29 }
 0x220   : > { %3247 = vmatprep.mubr.msk.f32.mxu1 %vm955_vm1, %v949_v31 }
 0x221   : > { %2635 = vperm.xlu0 %3717, %v2629_v30  }
 0x222   : > { %v1176_v32 = vpop.trf.xlu1 }
 0x223   : > { %3274 = vmatmul.mubr.msk.f32.gmra.mrb[18].mxu0 %vm955_vm1, %v1176_v32  ;;  %v950_v34 = vpop.trf.xlu0 }
 0x224   : > { %3248 = vmatmul.mubr.msk.f32.gmra.mrb[14].mxu1 %vm955_vm1, %v950_v34 }
 0x225   : > { %2645 = vperm.xlu0 %3717, %v2631_v33  }
 0x226   : > { %v1177_v35 = vpop.trf.xlu1 }
 0x227   : > { %v951_v36 = vpop.trf.xlu0  ;;  %3276 = vmatprep.mubr.msk.f32.mxu0 %vm955_vm1, %v1177_v35 }
 0x228   : > { %3250 = vmatprep.mubr.msk.f32.mxu1 %vm955_vm1, %v951_v36 }
 0x22a   : > { %v1178_v37 = vpop.trf.xlu1 }
 0x22b   : > { %3277 = vmatmul.mubr.msk.f32.gmra.mrb[20].mxu0 %vm955_vm1, %v1178_v37  ;;  %v952_v38 = vpop.trf.xlu0 }
 0x22c   : > { %3251 = vmatmul.mubr.msk.f32.gmra.mrb[16].mxu1 %vm955_vm1, %v952_v38 }
 0x22e   : > { %v1179_v39 = vpop.trf.xlu1 }
 0x22f   : > { %v953_v40 = vpop.trf.xlu0  ;;  %3279 = vmatprep.mubr.msk.f32.mxu0 %vm955_vm1, %v1179_v39 }
 0x230   : > { %3253 = vmatprep.mubr.msk.f32.mxu1 %vm955_vm1, %v953_v40 }
 0x232   : > { %v1180_v41 = vpop.trf.xlu1 }
 0x233   : > { %3280 = vmatmul.mubr.msk.f32.gmra.mrb[22].mxu0 %vm955_vm1, %v1180_v41  ;;  %v954_v42 = vpop.trf.xlu0 }
 0x234   : > { %3254 = vmatmul.mubr.msk.f32.gmra.mrb[18].mxu1 %vm955_vm1, %v954_v42 }
 0x236   : > { %v1615_v43 = vpop.trf.xlu1 }
 0x237   : > { %v1390_v44 = vpop.trf.xlu0  ;;  %3310 = vmatprep.mubr.msk.f32.mxu0 %vm955_vm1, %v1615_v43 }
 0x238   : > { %3284 = vmatprep.mubr.msk.f32.mxu1 %vm955_vm1, %v1390_v44 }
 0x23a   : > { %v1616_v45 = vpop.trf.xlu1 }
 0x23b   : > { %3311 = vmatmul.mubr.msk.f32.vlgmr.msra.gmra.mrb[24].mxu0 %vm955_vm1, %v1616_v45  ;;  %v1391_v46 = vpop.trf.xlu0 }
 0x23c   : > { %3285 = vmatmul.mubr.msk.f32.vlgmr.msra.gmra.mrb[20].mxu1 %vm955_vm1, %v1391_v46 }
 0x23e   : > { %v1617_v47 = vpop.trf.xlu1 }
 0x23f   : > { %v1392_v48 = vpop.trf.xlu0  ;;  %3313 = vmatprep.mubr.msk.f32.mxu0 %vm955_vm1, %v1617_v47 }
 0x240   : > { %3287 = vmatprep.mubr.msk.f32.mxu1 %vm955_vm1, %v1392_v48 }
 0x242   : > { %v1618_v49 = vpop.trf.xlu1 }
 0x243   : > { %v1393_v50 = vpop.trf.xlu0  ;;  %3314 = vmatmul.mubr.msk.f32.gmra.mrb[26].mxu0 %vm955_vm1, %v1618_v49 }
 0x244   : > { %3288 = vmatmul.mubr.msk.f32.gmra.mrb[22].mxu1 %vm955_vm1, %v1393_v50 }
 0x246   : > { %v1619_v51 = vpop.trf.xlu1 }
 0x247   : > { %v1394_v52 = vpop.trf.xlu0  ;;  %3316 = vmatprep.mubr.msk.f32.mxu0 %vm955_vm1, %v1619_v51 }
 0x248   : > { %3290 = vmatprep.mubr.msk.f32.mxu1 %vm955_vm1, %v1394_v52 }
 0x24a   : > { %v1620_v53 = vpop.trf.xlu1 }
 0x24b   : > { %v1395_v54 = vpop.trf.xlu0  ;;  %3317 = vmatmul.mubr.msk.f32.gmra.mrb[28].mxu0 %vm955_vm1, %v1620_v53 }
 0x24c   : > { %3291 = vmatmul.mubr.msk.f32.gmra.mrb[24].mxu1 %vm955_vm1, %v1395_v54 }
 0x24e   : > { %v1621_v55 = vpop.trf.xlu1 }
 0x24f   : > { %v1396_v56 = vpop.trf.xlu0  ;;  %3319 = vmatprep.mubr.msk.f32.mxu0 %vm955_vm1, %v1621_v55 }
 0x250   : > { %3293 = vmatprep.mubr.msk.f32.mxu1 %vm955_vm1, %v1396_v56 }
 0x252   : > { %v1622_v57 = vpop.trf.xlu1 }
 0x253   : > { %v1397_v58 = vpop.trf.xlu0  ;;  %3320 = vmatmul.mubr.msk.f32.gmra.mrb[30].mxu0 %vm955_vm1, %v1622_v57 }
 0x254   : > { %3294 = vmatmul.mubr.msk.f32.gmra.mrb[26].mxu1 %vm955_vm1, %v1397_v58 }
 0x256   : > { %v1623_v59 = vpop.trf.xlu1 }
 0x257   : > { %v1398_v60 = vpop.trf.xlu0  ;;  %3322 = vmatprep.mubr.msk.f32.mxu0 %vm955_vm1, %v1623_v59 }
 0x258   : > { %3296 = vmatprep.mubr.msk.f32.mxu1 %vm955_vm1, %v1398_v60 }
 0x25a   : > { %v1624_v61 = vpop.trf.xlu1 }
 0x25b   : > { %v1399_v62 = vpop.trf.xlu0  ;;  %3323 = vmatmul.mubr.msk.f32.gmra.mrb[32].mxu0 %vm955_vm1, %v1624_v61 }
 0x25c   : > { %3297 = vmatmul.mubr.msk.f32.gmra.mrb[28].mxu1 %vm955_vm1, %v1399_v62 }
 0x25e   : > { %v1625_v0 = vpop.trf.xlu1 }
 0x25f   : > { %v1400_v1 = vpop.trf.xlu0  ;;  %3325 = vmatprep.mubr.msk.f32.mxu0 %vm955_vm1, %v1625_v0 }
 0x260   : > { %3299 = vmatprep.mubr.msk.f32.mxu1 %vm955_vm1, %v1400_v1 }
 0x262   : > { %v1626_v2 = vpop.trf.xlu1 }
 0x263   : > { %v1401_v3 = vpop.trf.xlu0  ;;  %3326 = vmatmul.mubr.msk.f32.gmra.mrb[34].mxu0 %vm955_vm1, %v1626_v2 }
 0x264   : > { %3300 = vmatmul.mubr.msk.f32.gmra.mrb[30].mxu1 %vm955_vm1, %v1401_v3 }
 0x266   : > { %v1627_v4 = vpop.trf.xlu1 }
 0x267   : > { %v1402_v5 = vpop.trf.xlu0  ;;  %3328 = vmatprep.mubr.msk.f32.mxu0 %vm955_vm1, %v1627_v4 }
 0x268   : > { %3302 = vmatprep.mubr.msk.f32.mxu1 %vm955_vm1, %v1402_v5 }
 0x26a   : > { %v1628_v6 = vpop.trf.xlu1 }
 0x26b   : > { %v1403_v7 = vpop.trf.xlu0  ;;  %3329 = vmatmul.mubr.msk.f32.gmra.mrb[36].mxu0 %vm955_vm1, %v1628_v6 }
 0x26c   : > { %3303 = vmatmul.mubr.msk.f32.gmra.mrb[32].mxu1 %vm955_vm1, %v1403_v7 }
 0x26e   : > { %v1629_v8 = vpop.trf.xlu1 }
 0x26f   : > { %v1404_v9 = vpop.trf.xlu0  ;;  %3331 = vmatprep.mubr.msk.f32.mxu0 %vm955_vm1, %v1629_v8 }
 0x270   : > { %3305 = vmatprep.mubr.msk.f32.mxu1 %vm955_vm1, %v1404_v9 }
 0x272   : > { %v1630_v10 = vpop.trf.xlu1 }
 0x273   : > { %v1405_v11 = vpop.trf.xlu0  ;;  %3332 = vmatmul.mubr.msk.f32.gmra.mrb[38].mxu0 %vm955_vm1, %v1630_v10 }
 0x274   : > { %3306 = vmatmul.mubr.msk.f32.gmra.mrb[34].mxu1 %vm955_vm1, %v1405_v11  ;;  %3401 = vmatprep.mubr.msk.f32.mxu0 %vm3973_vm2, %v3974_v14 }
 0x275   : > { %3366 = vmatprep.mubr.msk.f32.mxu1 %vm3973_vm2, %v3974_v14 }
 0x2ce   : > { %v4429_v15 = vpop.f32.mrb[8].mxu0 }
 0x2cf   : > { %v4431_v17 = vpop.f32.mrb[4].mxu1  ;;  %v4433_v18 = vpop.f32.mrb[9].mxu0 }
 0x2d0   : > { %v1974_v19 = vmax.f32 %v4433_v18, %v4429_v15  ;;  %v4437_v20 = vpop.f32.mrb[5].mxu1 }
 0x2d1   : > { %v1953_v21 = vmax.f32 %v4437_v20, %v4431_v17 }
 0x2d2   : > { %v1975_v22 = vmax.f32 %v1974_v19, -1e+09 }
 0x2d3   : > { %v1954_v23 = vmax.f32 %v1953_v21, -1e+09 }
 0x2d4   : > { %v1976_v24 = vmax.f32 %v1975_v22, -1e+09 }
 0x2d5   : > { %v1955_v26 = vmax.f32 %v1954_v23, -1e+09 }
 0x2d6   : > { %v1977_v27 = vmax.f32 %v1976_v24, -1e+09  ;;  %v3263_v28 = vpop.f32.mrb[10].mxu0 }
 0x2d7   : > { %v1956_v29 = vmax.f32 %v1955_v26, -1e+09  ;;  %v3237_v30 = vpop.f32.mrb[6].mxu1  ;;  %v1305_v31 = vpop.f32.mrb[11].mxu0 }
 0x2d8   : > { %v1978_v32 = vmax.f32 %v1977_v27, -1e+09  ;;  %v1080_v33 = vpop.f32.mrb[7].mxu1 }
 0x2d9   : > { %v1957_v34 = vmax.f32 %v1956_v29, -1e+09 }
 0x2da   : > { %v1979_v35 = vmax.f32 %v1978_v32, -1e+09 }
 0x2db   : > { %v1958_v36 = vmax.f32 %v1957_v34, -1e+09 }
 0x2dc   : > { %v1980_v37 = vmax.f32 %v1979_v35, -1e+09 }
 0x2dd   : > { %v1959_v38 = vmax.f32 %v1958_v36, -1e+09 }
 0x2de   : > { %v1981_v39 = vmax.f32 %v1980_v37, -1e+09  ;;  %v3266_v40 = vpop.f32.mrb[12].mxu0 }
 0x2df   : > { %v1960_v41 = vmax.f32 %v1959_v38, -1e+09  ;;  %v3240_v42 = vpop.f32.mrb[8].mxu1  ;;  %v1315_v43 = vpop.f32.mrb[13].mxu0 }
 0x2e0   : > { %v1982_v44 = vmax.f32 %v1981_v39, -1e+09  ;;  %v1090_v45 = vpop.f32.mrb[9].mxu1 }
 0x2e1   : > { %v1961_v46 = vmax.f32 %v1960_v41, -1e+09 }
 0x2e2   : > { %v1983_v47 = vmax.f32 %v1982_v44, -1e+09 }
 0x2e3   : > { %v1962_v48 = vmax.f32 %v1961_v46, -1e+09 }
 0x2e4   : > { %v1984_v49 = vmax.f32 %v1983_v47, -1e+09 }
 0x2e5   : > { %v1963_v50 = vmax.f32 %v1962_v48, -1e+09 }
 0x2e6   : > { %v1985_v51 = vmax.f32 %v1984_v49, -1e+09  ;;  %v3269_v52 = vpop.f32.mrb[14].mxu0 }
 0x2e7   : > { %v1964_v53 = vmax.f32 %v1963_v50, -1e+09  ;;  %v3243_v54 = vpop.f32.mrb[10].mxu1  ;;  %v1325_v55 = vpop.f32.mrb[15].mxu0 }
 0x2e8   : > { %v1986_v56 = vmax.f32 %v1985_v51, -1e+09  ;;  %v1100_v57 = vpop.f32.mrb[11].mxu1 }
 0x2e9   : > { %v1965_v58 = vmax.f32 %v1964_v53, -1e+09 }
 0x2ea   : > { %v1987_v59 = vmax.f32 %v1986_v56, -1e+09 }
 0x2eb   : > { %v1966_v60 = vmax.f32 %v1965_v58, -1e+09 }
 0x2ec   : > { %v1988_v61 = vmax.f32 %v1987_v59, -1e+09 }
 0x2ed   : > { %v1967_v62 = vmax.f32 %v1966_v60, -1e+09 }
 0x2ee   : > { %v1989_v0 = vrot.slane %v1988_v61, 4  ;;  %v3272_v1 = vpop.f32.mrb[16].mxu0 }
 0x2ef   : > { %v1968_v2 = vrot.slane %v1967_v62, 4  ;;  %v3246_v3 = vpop.f32.mrb[12].mxu1  ;;  %v1335_v4 = vpop.f32.mrb[17].mxu0 }
 0x2f0   : > { %v1990_v5 = vmax.f32 %v1988_v61, %v1989_v0  ;;  %v1110_v6 = vpop.f32.mrb[13].mxu1 }
 0x2f1   : > { %v1969_v7 = vmax.f32 %v1967_v62, %v1968_v2 }
 0x2f2   : > { %v1991_v8 = vrot.slane %v1990_v5, 2 }
 0x2f3   : > { %v1970_v9 = vrot.slane %v1969_v7, 2 }
 0x2f4   : > { %v1992_v10 = vmax.f32 %v1990_v5, %v1991_v8 }
 0x2f5   : > { %v1971_v11 = vmax.f32 %v1969_v7, %v1970_v9 }
 0x2f6   : > { %v1993_v19 = vrot.slane %v1992_v10, 1  ;;  %v3275_v21 = vpop.f32.mrb[18].mxu0 }
 0x2f7   : > { %v1972_v22 = vrot.slane %v1971_v11, 1  ;;  %v3249_v23 = vpop.f32.mrb[14].mxu1  ;;  %v1345_v24 = vpop.f32.mrb[19].mxu0 }
 0x2f8   : > { %v4441_v26 = vmax.f32 %v1992_v10, %v1993_v19  ;;  %v1120_v27 = vpop.f32.mrb[15].mxu1 }
 0x2f9   : > { %v4443_v28 = vmax.f32 %v1971_v11, %v1972_v22 }
 0x2fa   : > { %v2065_v29 = vsub.f32 %v4433_v18, %v4441_v26  ;;  %v2066_v30 = vsub.f32 %v4429_v15, %v4441_v26  ;;  %v2067_v31 = vsub.f32 -1e+09, %v4441_v26 }
 0x2fb   : > { %v2049_v32 = vsub.f32 %v4437_v20, %v4443_v28  ;;  %v2050_v33 = vsub.f32 %v4431_v17, %v4443_v28  ;;  %v2051_v34 = vsub.f32 -1e+09, %v4443_v28 }
 0x2fc   : > { %v2145_v35 = vmul.f32 1.442695, %v2065_v29  ;;  %v2147_v36 = vmul.f32 1.442695, %v2066_v30  ;;  %v2149_v37 = vmul.f32 1.442695, %v2067_v31 }
 0x2fd   : > { %v2113_v38 = vmul.f32 1.442695, %v2049_v32  ;;  %v2115_v39 = vmul.f32 1.442695, %v2050_v33  ;;  %v2117_v41 = vmul.f32 1.442695, %v2051_v34 }
 0x2fe   : > { %3719 = vpow2.f32 %v2145_v35  ;;  %v3278_v18 = vpop.f32.mrb[20].mxu0 }
 0x2ff   : > { %3721 = vpow2.f32 %v2147_v36  ;;  %v3252_v40 = vpop.f32.mrb[16].mxu1  ;;  %v1355_v15 = vpop.f32.mrb[21].mxu0 }
 0x300   : > { %3723 = vpow2.f32 %v2149_v37  ;;  %v1130_v42 = vpop.f32.mrb[17].mxu1 }
 0x301   : > { %3725 = vpow2.f32 %v2113_v38 }
 0x302   : > { %3727 = vpow2.f32 %v2115_v39 }
 0x303   : > { %3729 = vpow2.f32 %v2117_v41  ;;  %v2038_v41 = vsub.f32 -inf, %v4441_v26 }
 0x306   : > { %v3281_v20 = vpop.f32.mrb[22].mxu0 }
 0x307   : > { %v3255_v17 = vpop.f32.mrb[18].mxu1  ;;  %v1365_v43 = vpop.f32.mrb[23].mxu0 }
 0x308   : > { %v3720_v44 = vpop.eup %3719  ;;  %v1140_v45 = vpop.f32.mrb[19].mxu1 }
 0x309   : > { %v3722_v46 = vpop.eup %3721 }
 0x30a   : > { %v4455_v47 = vpop.eup %3723  ;;  %v2266_v48 = vadd.f32 %v3722_v46, %v3720_v44  ;;  %v3537_v49 = vpack.c.bf16 %v3722_v46, %v3720_v44 }
 0x30b   : > { %v3726_v50 = vpop.eup %3725  ;;  %v4466_v58 = vpack.c.bf16 %v4455_v47, %v4455_v47 }
 0x30c   : > { %v3728_v51 = vpop.eup %3727  ;;  %v2267_v52 = vadd.f32 %v4455_v47, %v2266_v48  ;;  %3538 = vmatpush3.bf16.msra.mxu0 %v3537_v49 }
 0x30d   : > { %v2245_v53 = vadd.f32 %v3728_v51, %v3726_v50  ;;  %v3513_v54 = vpack.c.bf16 %v3728_v51, %v3726_v50  ;;  %3539 = vmatprep.subr.bf16.mxu0 %v3972_v12  ;;  %v4459_v55 = vpop.eup %3729  ;;  %v2037_v51 = vsub.f32 -inf, %v4443_v28 }
 0x30e   : > { %v2268_v56 = vadd.f32 %v4455_v47, %v2267_v52  ;;  %v4462_v57 = vpop.f32.mrb[24].mxu0  ;;  %v4485_v4 = vpack.c.bf16 %v4459_v55, %v4459_v55 }
 0x30f   : > { %v2246_v59 = vadd.f32 %v4459_v55, %v2245_v53  ;;  %3514 = vmatpush3.bf16.msra.mxu1 %v3513_v54  ;;  %v4469_v60 = vpop.f32.mrb[20].mxu1  ;;  %v4471_v61 = vpop.f32.mrb[25].mxu0  ;;  %v2043_v53 = vmul.f32 1.442695, %v2038_v41 }
 0x310   : > { %v2269_v62 = vadd.f32 %v4455_v47, %v2268_v56  ;;  %v2016_v0 = vmax.f32 %v4471_v61, %v4462_v57  ;;  %3515 = vmatprep.subr.bf16.mxu1 %v3972_v12  ;;  %3541 = vmatpush3.bf16.msra.mxu0 %v4466_v58  ;;  %v4478_v1 = vpop.f32.mrb[21].mxu1 }
 0x311   : > { %v2247_v2 = vadd.f32 %v4459_v55, %v2246_v59  ;;  %v1995_v3 = vmax.f32 %v4478_v1, %v4469_v60  ;;  %3542 = vmatprep.subr.bf16.mxu0 %v3972_v12  ;;  %3731 = vpow2.f32 %v2043_v53 }
 0x312   : > { %v2270_v5 = vadd.f32 %v4455_v47, %v2269_v62  ;;  %v2017_v6 = vmax.f32 %v2016_v0, -1e+09 }
 0x313   : > { %v2248_v7 = vadd.f32 %v4459_v55, %v2247_v2  ;;  %v1996_v8 = vmax.f32 %v1995_v3, -1e+09  ;;  %3517 = vmatpush3.bf16.msra.mxu1 %v4485_v4  ;;  %v2041_v3 = vmul.f32 1.442695, %v2037_v51 }
 0x314   : > { %v2271_v9 = vadd.f32 %v4455_v47, %v2270_v5  ;;  %v2018_v10 = vmax.f32 %v2017_v6, -1e+09  ;;  %3518 = vmatprep.subr.bf16.mxu1 %v3972_v12  ;;  %3544 = vmatpush3.bf16.msra.mxu0 %v4466_v58 }
 0x315   : > { %v2249_v11 = vadd.f32 %v4459_v55, %v2248_v7  ;;  %v1997_v19 = vmax.f32 %v1996_v8, -1e+09  ;;  %3545 = vmatprep.subr.bf16.mxu0 %v3972_v12  ;;  %v668_v7 = vpop.permute.xlu1 %667  ;;  %3733 = vpow2.f32 %v2041_v3 }
 0x316   : > { %v2272_v21 = vadd.f32 %v4455_v47, %v2271_v9  ;;  %v2019_v22 = vmax.f32 %v2018_v10, -1e+09  ;;  %v3315_v23 = vpop.f32.mrb[26].mxu0 }
 0x317   : > { %v2250_v24 = vadd.f32 %v4459_v55, %v2249_v11  ;;  %v1998_v27 = vmax.f32 %v1997_v19, -1e+09  ;;  %3520 = vmatpush3.bf16.msra.mxu1 %v4485_v4  ;;  %v3289_v29 = vpop.f32.mrb[22].mxu1  ;;  %v1755_v30 = vpop.f32.mrb[27].mxu0 }
 0x318   : > { %v2020_v31 = vmax.f32 %v2019_v22, -1e+09  ;;  %3521 = vmatprep.subr.bf16.mxu1 %v3972_v12  ;;  %3547 = vmatpush3.bf16.msra.mxu0 %v4466_v58  ;;  %v1530_v32 = vpop.f32.mrb[23].mxu1  ;;  %v2273_v33 = vadd.f32 %v4455_v47, %v2272_v21  ;;  %v764_v29 = vadd.f32 %v4327_v63, %v668_v7  ;;  %v663_v30 = vpop.permute.xlu0 %662 }
 0x319   : > { %v2251_v34 = vadd.f32 %v4459_v55, %v2250_v24  ;;  %v1999_v35 = vmax.f32 %v1998_v27, -1e+09  ;;  %3548 = vmatprep.subr.bf16.mxu0 %v3972_v12 }
 0x31a   : > { %v2021_v36 = vmax.f32 %v2020_v31, -1e+09  ;;  %v2274_v37 = vadd.f32 %v4455_v47, %v2273_v33 }
 0x31b   : > { %v2000_v38 = vmax.f32 %v1999_v35, -1e+09  ;;  %3523 = vmatpush3.bf16.msra.mxu1 %v4485_v4  ;;  %v2252_v39 = vadd.f32 %v4459_v55, %v2251_v34 }
 0x31c   : > { %v2022_v18 = vmax.f32 %v2021_v36, -1e+09  ;;  %3524 = vmatprep.subr.bf16.mxu1 %v3972_v12  ;;  %3550 = vmatpush3.bf16.msra.mxu0 %v4466_v58  ;;  %v2275_v40 = vadd.f32 %v4455_v47, %v2274_v37 }
 0x31d   : > { %v2001_v15 = vmax.f32 %v2000_v38, -1e+09  ;;  %3551 = vmatprep.subr.bf16.mxu0 %v3972_v12  ;;  %v2253_v42 = vadd.f32 %v4459_v55, %v2252_v39 }
 0x31e   : > { %v2023_v20 = vmax.f32 %v2022_v18, -1e+09  ;;  %v3318_v17 = vpop.f32.mrb[28].mxu0  ;;  %v2276_v43 = vadd.f32 %v4455_v47, %v2275_v40  ;;  %v3732_v40 = vpop.eup %3731 }
 0x31f   : > { %v2002_v44 = vmax.f32 %v2001_v15, -1e+09  ;;  %3526 = vmatpush3.bf16.msra.mxu1 %v4485_v4  ;;  %v3292_v45 = vpop.f32.mrb[24].mxu1  ;;  %v1765_v46 = vpop.f32.mrb[29].mxu0  ;;  %v2254_v48 = vadd.f32 %v4459_v55, %v2253_v42 }
 0x320   : > { %v2024_v49 = vmax.f32 %v2023_v20, -1e+09  ;;  %3527 = vmatprep.subr.bf16.mxu1 %v3972_v12  ;;  %3553 = vmatpush3.bf16.msra.mxu0 %v4466_v58  ;;  %v1540_v50 = vpop.f32.mrb[25].mxu1  ;;  %v2277_v26 = vadd.f32 %v4455_v47, %v2276_v43  ;;  %v3734_v45 = vpop.eup %3733 }
 0x321   : > { %v2003_v52 = vmax.f32 %v2002_v44, -1e+09  ;;  %3554 = vmatprep.subr.bf16.mxu0 %v3972_v12  ;;  %v2255_v54 = vadd.f32 %v4459_v55, %v2254_v48  ;;  %v4545_v48 = vmul.f32 0.0, %v3732_v40  ;;  %v4550_v53 = vmul.f32 0.0, %v3734_v45 }
 0x322   : > { %v2025_v56 = vmax.f32 %v2024_v49, -1e+09  ;;  %v2278_v59 = vadd.f32 %v4455_v47, %v2277_v26 }
 0x323   : > { %v2004_v62 = vmax.f32 %v2003_v52, -1e+09  ;;  %3529 = vmatpush3.bf16.msra.mxu1 %v4485_v4  ;;  %v2256_v0 = vadd.f32 %v4459_v55, %v2255_v54 }
 0x324   : > { %v2026_v2 = vmax.f32 %v2025_v56, -1e+09  ;;  %3530 = vmatprep.subr.bf16.mxu1 %v3972_v12  ;;  %3556 = vmatpush3.bf16.msra.mxu0 %v4466_v58  ;;  %v2279_v28 = vadd.f32 %v4455_v47, %v2278_v59 }
 0x325   : > { %v2005_v5 = vmax.f32 %v2004_v62, -1e+09  ;;  %3557 = vmatprep.subr.bf16.mxu0 %v3972_v12  ;;  %v2257_v6 = vadd.f32 %v4459_v55, %v2256_v0 }
 0x326   : > { %v2027_v8 = vmax.f32 %v2026_v2, -1e+09  ;;  %v3321_v9 = vpop.f32.mrb[30].mxu0  ;;  %v2280_v10 = vadd.f32 %v4455_v47, %v2279_v28 }
 0x327   : > { %v2006_v11 = vmax.f32 %v2005_v5, -1e+09  ;;  %3532 = vmatpush3.bf16.msra.mxu1 %v4485_v4  ;;  %v3295_v19 = vpop.f32.mrb[26].mxu1  ;;  %v1775_v21 = vpop.f32.mrb[31].mxu0  ;;  %v2258_v22 = vadd.f32 %v4459_v55, %v2257_v6 }
 0x328   : > { %v2028_v23 = vmax.f32 %v2027_v8, -1e+09  ;;  %3533 = vmatprep.subr.bf16.mxu1 %v3972_v12  ;;  %3559 = vmatpush3.bf16.msra.mxu0 %v4466_v58  ;;  %v1550_v24 = vpop.f32.mrb[27].mxu1  ;;  %v2281_v27 = vrot.slane %v2280_v10, 4  ;;  %v759_v58 = vadd.f32 %v4344_v13, %v663_v30 }
 0x329   : > { %v2007_v31 = vmax.f32 %v2006_v11, -1e+09  ;;  %3584 = vmatprep.subr.bf16.mxu0 %v3972_v12  ;;  %v2259_v47 = vadd.f32 %v4459_v55, %v2258_v22 }
 0x32a   : > { %v2029_v32 = vmax.f32 %v2028_v23, -1e+09  ;;  %v2282_v33 = vadd.f32 %v2281_v27, %v2280_v10 }
 0x32b   : > { %v2008_v34 = vmax.f32 %v2007_v31, -1e+09  ;;  %3535 = vmatpush3.bf16.msra.mxu1 %v4485_v4  ;;  %3402 = vmatmul.mubr.f32.vlgmr.msra.gmra.mrb[40].mxu0 %v764_v29  ;;  %v2260_v35 = vrot.slane %v2259_v47, 4 }
 0x32c   : > { %v2030_v36 = vmax.f32 %v2029_v32, -1e+09  ;;  %3560 = vmatprep.subr.bf16.mxu1 %v3972_v12  ;;  %3471 = vmatprep.mubr.msk.f32.mxu0 %vm3973_vm2, %v3974_v14  ;;  %v2283_v63 = vrot.slane %v2282_v33, 2 }
 0x32d   : > { %v2009_v37 = vmax.f32 %v2008_v34, -1e+09  ;;  %v2261_v38 = vadd.f32 %v2260_v35, %v2259_v47 }
 0x32e   : > { %v2031_v39 = vrot.slane %v2030_v36, 4  ;;  %3367 = vmatmul.mubr.f32.vlgmr.msra.gmra.mrb[36].mxu1 %v759_v58  ;;  %v3324_v55 = vpop.f32.mrb[32].mxu0  ;;  %v2284_v18 = vadd.f32 %v2283_v63, %v2282_v33 }
 0x32f   : > { %v2010_v15 = vrot.slane %v2009_v37, 4  ;;  %3436 = vmatprep.mubr.msk.f32.mxu1 %vm3973_vm2, %v3974_v14  ;;  %v3298_v4 = vpop.f32.mrb[28].mxu1  ;;  %v1785_v13 = vpop.f32.mrb[33].mxu0  ;;  %v2262_v41 = vrot.slane %v2261_v38, 2 }
 0x330   : > { %v2032_v42 = vmax.f32 %v2030_v36, %v2031_v39  ;;  %v1560_v20 = vpop.f32.mrb[29].mxu1  ;;  %v2285_v17 = vrot.slane %v2284_v18, 1 }
 0x331   : > { %v2011_v43 = vmax.f32 %v2009_v37, %v2010_v15  ;;  %v2263_v44 = vadd.f32 %v2262_v41, %v2261_v38 }
 0x332   : > { %v2033_v46 = vrot.slane %v2032_v42, 2  ;;  %v2286_v49 = vadd.f32 %v2285_v17, %v2284_v18 }
 0x333   : > { %v2012_v50 = vrot.slane %v2011_v43, 2  ;;  %v2264_v26 = vrot.slane %v2263_v44, 1 }
 0x334   : > { %v2034_v51 = vmax.f32 %v2032_v42, %v2033_v46  ;;  %v4548_v52 = vadd.f32 %v2286_v49, %v4545_v48 }
 0x335   : > { %v2013_v14 = vmax.f32 %v2011_v43, %v2012_v50  ;;  %v2265_v54 = vadd.f32 %v2264_v26, %v2263_v44 }
 0x336   : > { %v2035_v56 = vrot.slane %v2034_v51, 1  ;;  %v3327_v59 = vpop.f32.mrb[34].mxu0 }
 0x337   : > { %v2014_v62 = vrot.slane %v2013_v14, 1  ;;  %v3301_v0 = vpop.f32.mrb[30].mxu1  ;;  %v1795_v2 = vpop.f32.mrb[35].mxu0  ;;  %v4553_v28 = vadd.f32 %v2265_v54, %v4550_v53 }
 0x338   : > { %v4555_v3 = vmax.f32 %v2034_v51, %v2035_v56  ;;  %v1570_v5 = vpop.f32.mrb[31].mxu1 }
 0x339   : > { %v4557_v6 = vmax.f32 %v2013_v14, %v2014_v62 }
 0x33a   : > { %v2097_v7 = vsub.f32 %v4471_v61, %v4555_v3  ;;  %v2098_v8 = vsub.f32 %v4462_v57, %v4555_v3  ;;  %v2099_v9 = vsub.f32 -1e+09, %v4555_v3  ;;  %v2040_v54 = vsub.f32 -inf, %v4555_v3 }
 0x33b   : > { %v2081_v10 = vsub.f32 %v4478_v1, %v4557_v6  ;;  %v2082_v11 = vsub.f32 %v4469_v60, %v4557_v6  ;;  %v2083_v19 = vsub.f32 -1e+09, %v4557_v6  ;;  %v2039_v2 = vsub.f32 -inf, %v4557_v6 }
 0x33c   : > { %v2209_v21 = vmul.f32 1.442695, %v2097_v7  ;;  %v2211_v22 = vmul.f32 1.442695, %v2098_v8  ;;  %v2213_v23 = vmul.f32 1.442695, %v2099_v9 }
 0x33d   : > { %v2177_v24 = vmul.f32 1.442695, %v2081_v10  ;;  %v2179_v27 = vmul.f32 1.442695, %v2082_v11  ;;  %v2181_v30 = vmul.f32 1.442695, %v2083_v19  ;;  %v678_v11 = vpop.permute.xlu1 %677 }
 0x33e   : > { %3735 = vpow2.f32 %v2209_v21  ;;  %v3330_v61 = vpop.f32.mrb[36].mxu0  ;;  %v2047_v5 = vmul.f32 1.442695, %v2040_v54  ;;  %v2045_v10 = vmul.f32 1.442695, %v2039_v2 }
 0x33f   : > { %3737 = vpow2.f32 %v2211_v22  ;;  %v3304_v29 = vpop.f32.mrb[32].mxu1  ;;  %v1805_v57 = vpop.f32.mrb[37].mxu0 }
 0x340   : > { %3739 = vpow2.f32 %v2213_v23  ;;  %v1580_v31 = vpop.f32.mrb[33].mxu1  ;;  %v774_v23 = vadd.f32 %v4349_v16, %v678_v11 }
 0x341   : > { %3741 = vpow2.f32 %v2177_v24  ;;  %v673_v24 = vpop.permute.xlu0 %672  ;;  %v2641_v54 = vpop.permute.xlu1 %2640 }
 0x342   : > { %3743 = vpow2.f32 %v2179_v27  ;;  %v769_v57 = vadd.f32 %v4366_v25, %v673_v24  ;;  %v2625_v25 = vld [vmem:[%s4749_s25] sm:$0xff] }
 0x343   : > { %3745 = vpow2.f32 %v2181_v30 }
 0x344   : > { %3747 = vpow2.f32 %v2047_v5 }
 0x345   : > { %3749 = vpow2.f32 %v2045_v10  ;;  %v2651_v5 = vpop.permute.xlu1 %2650 }
 0x346   : > { %v3333_v1 = vpop.f32.mrb[38].mxu0  ;;  %3751 = vrcp.f32 %v4548_v52 }
 0x347   : > { %v3307_v60 = vpop.f32.mrb[34].mxu1  ;;  %v1815_v47 = vpop.f32.mrb[39].mxu0  ;;  %3753 = vrcp.f32 %v4553_v28 }
 0x348   : > { %v3736_v32 = vpop.eup %3735  ;;  %v1590_v33 = vpop.f32.mrb[35].mxu1 }
 0x349   : > { %v3738_v34 = vpop.eup %3737 }
 0x34a   : > { %v4569_v35 = vpop.eup %3739  ;;  %v2308_v58 = vadd.f32 %v3738_v34, %v3736_v32  ;;  %v3585_v36 = vpack.c.bf16 %v3738_v34, %v3736_v32 }
 0x34b   : > { %v3742_v63 = vpop.eup %3741  ;;  %v3588_v15 = vpack.c.bf16 %v4569_v35, %v4569_v35 }
 0x34c   : > { %v3744_v37 = vpop.eup %3743  ;;  %v2309_v38 = vadd.f32 %v4569_v35, %v2308_v58  ;;  %3586 = vmatpush3.bf16.msra.mxu0 %v3585_v36 }
 0x34d   : > { %v2287_v39 = vadd.f32 %v3744_v37, %v3742_v63  ;;  %v3561_v55 = vpack.c.bf16 %v3744_v37, %v3742_v63  ;;  %3587 = vmatprep.subr.bf16.mxu0 %v3972_v12  ;;  %v4573_v18 = vpop.eup %3745 }
 0x34e   : > { %v2310_v40 = vadd.f32 %v4569_v35, %v2309_v38  ;;  %v3564_v42 = vpack.c.bf16 %v4573_v18, %v4573_v18  ;;  %v3748_v60 = vpop.eup %3747 }
 0x34f   : > { %v2288_v4 = vadd.f32 %v4573_v18, %v2287_v39  ;;  %3562 = vmatpush3.bf16.msra.mxu1 %v3561_v55  ;;  %v3750_v33 = vpop.eup %3749  ;;  %v2244_v34 = vmul.f32 0.0, %v3748_v60 }
 0x350   : > { %v2311_v13 = vadd.f32 %v4569_v35, %v2310_v40  ;;  %3563 = vmatprep.subr.bf16.mxu1 %v3972_v12  ;;  %3589 = vmatpush3.bf16.msra.mxu0 %v3588_v15  ;;  %v2243_v36 = vmul.f32 0.0, %v3750_v33 }
 0x351   : > { %v2289_v41 = vadd.f32 %v4573_v18, %v2288_v4  ;;  %3590 = vmatprep.subr.bf16.mxu0 %v3972_v12 }
 0x352   : > { %v2312_v20 = vadd.f32 %v4569_v35, %v2311_v13 }
 0x353   : > { %v2290_v17 = vadd.f32 %v4573_v18, %v2289_v41  ;;  %3565 = vmatpush3.bf16.msra.mxu1 %v3564_v42 }
 0x354   : > { %v2313_v43 = vadd.f32 %v4569_v35, %v2312_v20  ;;  %3566 = vmatprep.subr.bf16.mxu1 %v3972_v12  ;;  %3592 = vmatpush3.bf16.msra.mxu0 %v3588_v15 }
 0x355   : > { %v2291_v44 = vadd.f32 %v4573_v18, %v2290_v17  ;;  %3593 = vmatprep.subr.bf16.mxu0 %v3972_v12 }
 0x356   : > { %v2314_v45 = vadd.f32 %v4569_v35, %v2313_v43 }
 0x357   : > { %v2292_v46 = vadd.f32 %v4573_v18, %v2291_v44  ;;  %3568 = vmatpush3.bf16.msra.mxu1 %v3564_v42 }
 0x358   : > { %3569 = vmatprep.subr.bf16.mxu1 %v3972_v12  ;;  %3595 = vmatpush3.bf16.msra.mxu0 %v3588_v15  ;;  %v2315_v49 = vadd.f32 %v4569_v35, %v2314_v45 }
 0x359   : > { %v2293_v50 = vadd.f32 %v4573_v18, %v2292_v46  ;;  %3596 = vmatprep.subr.bf16.mxu0 %v3972_v12 }
 0x35a   : > { %v2316_v26 = vadd.f32 %v4569_v35, %v2315_v49 }
 0x35b   : > { %3571 = vmatpush3.bf16.msra.mxu1 %v3564_v42  ;;  %v2294_v51 = vadd.f32 %v4573_v18, %v2293_v50 }
 0x35c   : > { %3572 = vmatprep.subr.bf16.mxu1 %v3972_v12  ;;  %3598 = vmatpush3.bf16.msra.mxu0 %v3588_v15  ;;  %v2317_v14 = vadd.f32 %v4569_v35, %v2316_v26  ;;  %v2626_v26 = vld [vmem:[%s4749_s25 + $0x8] sm:$0xff] }
 0x35d   : > { %3599 = vmatprep.subr.bf16.mxu0 %v3972_v12  ;;  %v2295_v56 = vadd.f32 %v4573_v18, %v2294_v51  ;;  %v2627_v51 = vld [vmem:[%s4749_s25 + $0x10] sm:$0xff] }
 0x35e   : > { %v2318_v59 = vadd.f32 %v4569_v35, %v2317_v14  ;;  %v2628_v14 = vld [vmem:[%s4749_s25 + $0x18] sm:$0xff] }
 0x35f   : > { %3574 = vmatpush3.bf16.msra.mxu1 %v3564_v42  ;;  %v2296_v62 = vadd.f32 %v4573_v18, %v2295_v56  ;;  %v2636_v56 = vpop.permute.xlu0 %2635 }
 0x360   : > { %3575 = vmatprep.subr.bf16.mxu1 %v3972_v12  ;;  %3601 = vmatpush3.bf16.msra.mxu0 %v3588_v15  ;;  %v2319_v0 = vadd.f32 %v4569_v35, %v2318_v59 }
 0x361   : > { %3602 = vmatprep.subr.bf16.mxu0 %v3972_v12  ;;  %v2297_v7 = vadd.f32 %v4573_v18, %v2296_v62 }
 0x362   : > { %v2320_v3 = vadd.f32 %v4569_v35, %v2319_v0 }
 0x363   : > { %3577 = vmatpush3.bf16.msra.mxu1 %v3564_v42  ;;  %v2298_v8 = vadd.f32 %v4573_v18, %v2297_v7 }
 0x364   : > { %3578 = vmatprep.subr.bf16.mxu1 %v3972_v12  ;;  %3604 = vmatpush3.bf16.msra.mxu0 %v3588_v15  ;;  %v2321_v9 = vadd.f32 %v4569_v35, %v2320_v3  ;;  %v2646_v3 = vpop.permute.xlu0 %2645 }
 0x365   : > { %3605 = vmatprep.subr.bf16.mxu0 %v3972_v12  ;;  %v2299_v6 = vadd.f32 %v4573_v18, %v2298_v8 }
 0x366   : > { %v2322_v19 = vadd.f32 %v4569_v35, %v2321_v9 }
 0x367   : > { %3580 = vmatpush3.bf16.msra.mxu1 %v3564_v42  ;;  %v2300_v21 = vadd.f32 %v4573_v18, %v2299_v6 }
 0x368   : > { %3581 = vmatprep.subr.bf16.mxu1 %v3972_v12  ;;  %3607 = vmatpush3.bf16.msra.mxu0 %v3588_v15  ;;  %v2323_v22 = vrot.slane %v2322_v19, 4 }
 0x369   : > { %v2301_v27 = vadd.f32 %v4573_v18, %v2300_v21  ;;  %v3752_v18 = vpop.eup %3751 }
 0x36a   : > { %v2324_v61 = vadd.f32 %v2323_v22, %v2322_v19  ;;  %v3754_v41 = vpop.eup %3753 }
 0x36b   : > { %3583 = vmatpush3.bf16.msra.mxu1 %v3564_v42  ;;  %3472 = vmatmul.mubr.f32.vlgmr.msra.gmra.mrb[42].mxu0 %v774_v23  ;;  %v2302_v29 = vrot.slane %v2301_v27, 4 }
 0x36c   : > { %v2325_v30 = vrot.slane %v2324_v61, 2 }
 0x36d   : > { %v2303_v31 = vadd.f32 %v2302_v29, %v2301_v27 }
 0x36e   : > { %3437 = vmatmul.mubr.f32.vlgmr.msra.gmra.mrb[38].mxu1 %v769_v57  ;;  %v2326_v1 = vadd.f32 %v2325_v30, %v2324_v61 }
 0x36f   : > { %v2304_v12 = vrot.slane %v2303_v31, 2  ;;  %3482 = vmatprep.mubr.msk.f32.mxu1 %vm550_vm0, %v2625_v25 }
 0x370   : > { %v2327_v47 = vrot.slane %v2326_v1, 1 }
 0x371   : > { %v2305_v32 = vadd.f32 %v2304_v12, %v2303_v31 }
 0x372   : > { %v2328_v16 = vadd.f32 %v2327_v47, %v2326_v1 }
 0x373   : > { %v2306_v35 = vrot.slane %v2305_v32, 1 }
 0x374   : > { %v2332_v58 = vadd.f32 %v2328_v16, %v2244_v34 }
 0x375   : > { %v2307_v63 = vadd.f32 %v2306_v35, %v2305_v32 }
 0x376   : > { %3755 = vrcp.f32 %v2332_v58 }
 0x377   : > { %v2331_v37 = vadd.f32 %v2307_v63, %v2243_v36 }
 0x379   : > { %3757 = vrcp.f32 %v2331_v37 }
 0x380   : > { %v3756_v43 = vpop.eup %3755 }
 0x383   : > { %v3758_v49 = vpop.eup %3757 }
 0x3fe   : > { %v2469_v38 = vpop.f32.mrb[40].mxu0 }
 0x3ff   : > { %v2614_v39 = vadd.f32 %v2469_v38, %v4545_v48  ;;  %v3403_v55 = vpop.f32.mrb[41].mxu0 }
 0x401   : > { %v2622_v40 = vmul.f32 %v3752_v18, %v2614_v39  ;;  %v2399_v15 = vpop.f32.mrb[36].mxu1 }
 0x402   : > { %v2613_v4 = vadd.f32 %v2399_v15, %v4550_v53  ;;  %v3368_v13 = vpop.f32.mrb[37].mxu1 }
 0x404   : > { %v2621_v42 = vmul.f32 %v3754_v41, %v2613_v4 }
 0x406   : > { %v3608_v20 = vpack.c.bf16 %v2622_v40, %v2621_v42 }
 0x408   : > { %3609 = vmatprep.subr.bf16.mxu1 %v3608_v20 }
 0x409   : > { %3611 = vmatpush3.bf16.msra.mxu1 %v3608_v20 }
 0x43e   : > { %v2609_v52 = vpop.f32.mrb[42].mxu0 }
 0x43f   : > { %v2616_v17 = vadd.f32 %v2609_v52, %v2244_v34  ;;  %v3473_v28 = vpop.f32.mrb[43].mxu0 }
 0x441   : > { %v2624_v44 = vmul.f32 %v3756_v43, %v2616_v17  ;;  %v2539_v48 = vpop.f32.mrb[38].mxu1 }
 0x442   : > { %v2615_v45 = vadd.f32 %v2539_v48, %v2243_v36  ;;  %v3438_v46 = vpop.f32.mrb[39].mxu1 }
 0x444   : > { %v2623_v50 = vmul.f32 %v3758_v49, %v2615_v45 }
 0x446   : > { %v3612_v53 = vpack.c.bf16 %v2624_v44, %v2623_v50 }
 0x448   : > { %3613 = vmatprep.subr.bf16.mxu1 %v3612_v53 }
 0x449   : > { %3615 = vmatpush3.bf16.msra.mxu1 %v3612_v53 }
 0x44c   : > { %3483 = vmatmul.mubr.msk.f32.vlgmr.msra.gmra.mrb[40].mxu1 %vm550_vm0, %v2626_v26 }
 0x44d   : > { %3485 = vmatprep.mubr.msk.f32.mxu1 %vm550_vm0, %v2627_v51 }
 0x450   : > { %3486 = vmatmul.mubr.msk.f32.gmra.mrb[42].mxu1 %vm550_vm0, %v2628_v14 }
 0x51f   : > { %v3484_v59 = vpop.f32.mrb[40].mxu1 }
 0x520   : > { %v2737_v62 = vadd.f32 %v3484_v59, %v2641_v54  ;;  %v2731_v0 = vpop.f32.mrb[41].mxu1 }
 0x521   : > { %v2732_v2 = vadd.f32 %v2731_v0, %v2636_v56 }
 0x522   : > { %2751 = vst [vmem:[%s500_s17 + $0x8] sm:$0xff] %v2737_v62 }
 0x523   : > { %2750 = vst [vmem:[%s500_s17] sm:$0xff] %v2732_v2  ;;  %v3487_v7 = vpop.f32.mrb[42].mxu1 }
 0x524   : > { %v2747_v8 = vadd.f32 %v3487_v7, %v2651_v5  ;;  %v2741_v9 = vpop.f32.mrb[43].mxu1 }
 0x525   : > { %v2742_v10 = vadd.f32 %v2741_v9, %v2646_v3 }
 0x526   : > { %2753 = vst [vmem:[%s500_s17 + $0x18] sm:$0xff] %v2747_v8 }
 0x527   : > { %2752 = vst [vmem:[%s500_s17 + $0x10] sm:$0xff] %v2742_v10 }
 0x528   : > { %3886 = shalt.err (!%p3883_p4)
}
 0x529   : > { %s3887_s17 = scalar_lea.hbm %s4651_s10, 512  ;;  %s3891_s24 = scalar_lea.hbm %s4750_s8, 1024 }
 0x52a   : > { %p3888_p2 = scmp.ne.s32.totalorder %s4651_s10, %s3887_s17  ;;  %p3892_p1 = scmp.lt.u32.totalorder %s4651_s10, %s4750_s8 }
 0x52b   : > { %p3893_p11 = scmp.lt.u32.totalorder %s3891_s24, %s3887_s17  ;;  %p3895_p6 = scmp.lt.u32.totalorder %s3887_s17, %s4651_s10 }
 0x52c   : > { %p3889_p8 = pnand %p3888_p2, %p4198_p10 }
 0x52d   : > { %p3894_p13 = por %p3893_p11, %p3892_p1 }
 0x52e   : > { %p3890_p12 = pneg %p3889_p8 }
 0x52f   : > { %p3896_p3 = por %p3895_p6, %p3894_p13 }
 0x531   : > { %p3897_p5 = pnand %p3896_p3, %p3890_p12 }
 0x533   : > { %3900 = shalt.err (!%p3897_p5)
}
 0x534   : > { %s3976_s23 = smov 128   ;;  %s3977_s29 = smov 8  }
 0x535   : > { %3630 = dma.vmem_to_hbm [thread:$0]  (%p4198_p10), %s4646_s28, 512, %s4651_s10, %s2755_s20, %s3976_s23, %s3976_s23, %s3977_s29  }
 0x536 PF: > { %s4751_s26 = sld [smem:[#allocation17_spill]]  ;;  %s4752_s16 = sld [smem:[#allocation18_spill]] }
 0x537   : > { %p4754_p9 = scmp.ge.s32.totalorder %s3963_s22, 2 }
 0x53c   : > { %s2784_s15 = sand.u32 1, %s4751_s26   ;;  %p4753_p7 = scmp.ne.s32.totalorder %s4752_s16, 0 }
 0x53d   : > { %s2785_s17 = scalar_lea.sflag [#allocation6], %s2784_s15 }
 0x53e   : > { %p3647_p0 = pnand %p4754_p9, %p4753_p7 }
 0x540   : > { %3938 = dma.done.wait (!%p3647_p0), %s2785_s17, 512  }
 0x541   : > { %3940 = vsyncadd (!%p3647_p0), %s2785_s17, 4294966784  ;;  %s29_s22 = sadd.s32 1, %s3963_s22   ;;  %s4755_s17 = smov %s3947_s18 }
 0x542   : > { %p26_p4 = scmp.ge.s32.totalorder %s29_s22, 4   ;;  %s4756_s18 = smov %s3951_s19 }
 0x543   : > { %s4757_s19 = smov %s4210_s30  ;;  %s4758_s20 = smov %s3959_s21 }
 0x544   : > { %s4759_s21 = smov %s4761_s13  ;;  %28 = sbr.rel (!%p26_p4) target bundleno = 15 (0xf), region = 131 }
 0x54b   :  { %2790 = vsyncpa [#allocation5], 1 }
 0x54c   :  { %2792 = vsyncpa [#allocation5 + $0x1], 1 }
 0x54d   :  { %2793 = vsyncpa [#allocation8], 1 }
 0x54e   :  { %2794 = vsyncpa [#allocation11], 1 }
 0x54f   :  { %2795 = vsyncpa [#allocation6], 1 }
 0x550   :  { %2797 = vsyncpa [#allocation6 + $0x1], 1 }

</bundles_post_ra>
